<compile_context>
chip_gen: v5e
topology: v5e:2x2
jax: 0.10.0
libtpu: 0.0.40
codegen_flags: <defaults>
</compile_context>

<pallas_src>
import jax
import jax.numpy as jnp
from jax.experimental import pallas as pl
from jax.experimental.pallas import tpu as pltpu


# ----------------------------- fused forward kernel ---------------------------
def fused_forward_kernel(a1_ref, a2_ref, x_ref, w1_hbm, b1_ref,
                         w2_ref, b2_ref, idx_ref, o_ref, w1_vmem, w1_sem):
    f32, bf16 = jnp.float32, jnp.bfloat16
    R = a1_ref.shape[0]
    N = x_ref.shape[0]
    IN_F = x_ref.shape[1]
    HID = w2_ref.shape[0] // R
    E2 = idx_ref.shape[1]          # 2 * E_pad (pos lanes then neg lanes)
    eps2 = 1e-16                   # (eps = 1e-8)^2, clamp on squared norms

    # Start the W1 fetch (largest operand, left in HBM via pl.ANY) so it
    # overlaps the layer-1 aggregation matmuls below.
    w1_cp = pltpu.make_async_copy(w1_hbm, w1_vmem, w1_sem)
    w1_cp.start()

    # ---- layer 1 aggregation: ah_r = A_r @ X  (bf16 operands, f32 accumulate) --
    x_bf = x_ref[...].astype(bf16)
    ah1 = [jnp.dot(a1_ref[r].astype(bf16), x_bf,
                   preferred_element_type=f32).astype(bf16) for r in range(R)]

    w1_cp.wait()

    # ---- layer 1 projection: h1 = ReLU( sum_r ah_r @ W1_r + sum_r b1_r ) ------
    # Per-relation accumulation over static Ref slices (no lane-axis concat).
    h1 = jnp.dot(ah1[0], w1_vmem[0:IN_F, :], preferred_element_type=f32)
    for r in range(1, R):
        h1 = h1 + jnp.dot(ah1[r], w1_vmem[r * IN_F:(r + 1) * IN_F, :],
                          preferred_element_type=f32)
    # TODO(synk): move ReLU inside the relation loop if the original module
    #   applies per-relation activation before the hetero sum-aggregate.
    h1 = jnp.maximum(h1 + b1_ref[...], 0.0)                           # (N, HID)

    # ---- layer 2 ---------------------------------------------------------------
    h1_bf = h1.astype(bf16)
    ah2 = [jnp.dot(a2_ref[r].astype(bf16), h1_bf,
                   preferred_element_type=f32).astype(bf16) for r in range(R)]
    h2 = jnp.dot(ah2[0], w2_ref[0:HID, :], preferred_element_type=f32)
    for r in range(1, R):
        h2 = h2 + jnp.dot(ah2[r], w2_ref[r * HID:(r + 1) * HID, :],
                          preferred_element_type=f32)
    h2 = h2 + b2_ref[...]                                             # (N, OUT)

    # ---- cosine scores: pos + neg graphs in ONE lane-dense pass ----------------
    # Gram[i, j] = h2[i] . h2[j]; one-hot selector matmuls gather edge endpoints.
    gram = jax.lax.dot_general(h2, h2, (((1,), (1,)), ((), ())),
                               preferred_element_type=f32)            # (N, N)
    sq = jnp.sum(h2 * h2, axis=1, keepdims=True)                      # (N, 1)
    iota_n = jax.lax.broadcasted_iota(jnp.int32, (N, E2), 0)
    g_src = (iota_n == idx_ref[0:1, :]).astype(f32)                   # (N, E2)
    g_dst = (iota_n == idx_ref[1:2, :]).astype(f32)                   # (N, E2)
    t = jnp.dot(gram, g_dst, preferred_element_type=f32)              # (N, E2)
    dots = jnp.sum(g_src * t, axis=0, keepdims=True)                  # (1, E2)
    ss = jnp.sum(g_src * sq, axis=0, keepdims=True)                   # |h_src|^2
    dd = jnp.sum(g_dst * sq, axis=0, keepdims=True)                   # |h_dst|^2
    # NOTE: padded edge lanes carry index 0 and compute cos(h[0], h[0]) = 1.0;
    # they are sliced off in the wrapper. This is intentional wasted work so the
    # store below stays a single unmasked lane-dense vst -- don't "fix" the slice.
    o_ref[...] = (dots
                  * jax.lax.rsqrt(jnp.maximum(ss, eps2))
                  * jax.lax.rsqrt(jnp.maximum(dd, eps2)))


# ------------------------------ wrapper / module -------------------------------
def prepare_params(params):
    """One-time weight packing (do NOT call per step):
    vstack per-relation weights in bf16, pre-sum per-relation biases in f32."""
    R, IN_F, HID = params["W1"].shape
    _, _, OUT = params["W2"].shape
    return {
        "w1": params["W1"].reshape(R * IN_F, HID).astype(jnp.bfloat16),
        "w2": params["W2"].reshape(R * HID, OUT).astype(jnp.bfloat16),
        "b1": jnp.sum(params["b1"], axis=0).reshape(1, HID).astype(jnp.float32),
        "b2": jnp.sum(params["b2"], axis=0).reshape(1, OUT).astype(jnp.float32),
    }


@jax.jit
def double_gcn_cos_forward(prepared, pos_edges, neg_edges, block_adjs, x):
    """Equivalent of DoubleGCNcos.forward(pos_graph, neg_graph, blocks, x)."""
    A1, A2 = block_adjs                    # dense normalized adjacency per block
    E_pos = pos_edges.shape[1]
    E_neg = neg_edges.shape[1]
    E_pad = ((max(E_pos, E_neg, 1) + 127) // 128) * 128    # lane-dense edge axis

    def pad_edges(e):
        return jnp.pad(e.astype(jnp.int32), ((0, 0), (0, E_pad - e.shape[1])))

    # (2, 2*E_pad): row 0 = src, row 1 = dst; pos edges in lanes [0, E_pad),
    # neg edges in lanes [E_pad, 2*E_pad).
    idx = jnp.concatenate([pad_edges(pos_edges), pad_edges(neg_edges)], axis=1)

    vmem = pl.BlockSpec(memory_space=pltpu.MemorySpace.VMEM)
    # No grid: every operand fits VMEM at these sizes; whole-array VMEM specs,
    # except W1 which stays in HBM (pl.ANY) and is DMA'd manually in-kernel so
    # its transfer overlaps the layer-1 aggregation.
    scores = pl.pallas_call(
        fused_forward_kernel,
        out_shape=jax.ShapeDtypeStruct((1, 2 * E_pad), jnp.float32),
        in_specs=[vmem, vmem, vmem,
                  pl.BlockSpec(memory_space=pl.ANY),   # w1: manual DMA
                  vmem, vmem, vmem, vmem],
        out_specs=vmem,
        scratch_shapes=[pltpu.VMEM(prepared["w1"].shape, jnp.bfloat16),
                        pltpu.SemaphoreType.DMA(())],
    )(A1.astype(jnp.float32), A2.astype(jnp.float32), x.astype(jnp.float32),
      prepared["w1"], prepared["b1"], prepared["w2"], prepared["b2"], idx)

    pos_score = scores[0, :E_pos].reshape(E_pos, 1)
    neg_score = scores[0, E_pad:E_pad + E_neg].reshape(E_neg, 1)
    return pos_score, neg_score


def _sym_norm_adj(key, R, N):
    """Deterministic random dense adjacency with GraphConv-style sym normalization."""
    a = (jax.random.uniform(key, (R, N, N)) > 0.7).astype(jnp.float32)
    a = a + jnp.eye(N)[None]                 # self loops, no empty rows
    deg = jnp.sum(a, axis=-1)
    dinv = 1.0 / jnp.sqrt(deg)
    return a * dinv[:, :, None] * dinv[:, None, :]


if __name__ == "__main__":
    # Module-implied feature dims: in=512, hidden=256, out=64. Small graph sizes.
    IN_F, HID_F, OUT_F = 512, 256, 64
    N = 32            # nodes
    R = 2             # len(rel_names)
    E_POS, E_NEG = 16, 16

    key = jax.random.PRNGKey(0)
    k_x, k_a1, k_a2, k_w1, k_w2, k_b1, k_b2, k_pe, k_ne = jax.random.split(key, 9)

    x = jax.random.normal(k_x, (N, IN_F), dtype=jnp.float32)
    block_adjs = (_sym_norm_adj(k_a1, R, N), _sym_norm_adj(k_a2, R, N))

    params = {
        "W1": jax.random.normal(k_w1, (R, IN_F, HID_F), jnp.float32)
        * (1.0 / jnp.sqrt(IN_F)),
        "b1": jax.random.normal(k_b1, (R, HID_F), jnp.float32) * 0.01,
        "W2": jax.random.normal(k_w2, (R, HID_F, OUT_F), jnp.float32)
        * (1.0 / jnp.sqrt(HID_F)),
        "b2": jax.random.normal(k_b2, (R, OUT_F), jnp.float32) * 0.01,
    }

    pos_edges = jax.random.randint(k_pe, (2, E_POS), 0, N, dtype=jnp.int32)
    neg_edges = jax.random.randint(k_ne, (2, E_NEG), 0, N, dtype=jnp.int32)

    # One-time packing outside the per-step (jitted) path.
    prepared = prepare_params(params)
    prepared = jax.tree_util.tree_map(jax.block_until_ready, prepared)

    pos_score, neg_score = double_gcn_cos_forward(
        prepared, pos_edges, neg_edges, block_adjs, x
    )
    jax.block_until_ready((pos_score, neg_score))

    # ------------------------------- references ---------------------------------
    def ref_forward(mirror_bf16):
        def layer(A, H, W, b, relu):
            Rr = A.shape[0]
            if mirror_bf16:
                # Mirror the kernel numerics: bf16 operands on BOTH the A_r @ H
                # aggregation and the per-relation projection, f32 accumulation.
                Hb = H.astype(jnp.bfloat16)
                h = None
                for r in range(Rr):
                    ah = jnp.dot(A[r].astype(jnp.bfloat16), Hb,
                                 preferred_element_type=jnp.float32
                                 ).astype(jnp.bfloat16)
                    c = jnp.dot(ah, W[r].astype(jnp.bfloat16),
                                preferred_element_type=jnp.float32)
                    h = c if h is None else h + c
            else:          # pure f32 module semantics
                h = sum(A[r] @ H @ W[r] for r in range(Rr))
            h = h + jnp.sum(b, axis=0)[None, :]
            return jnp.maximum(h, 0.0) if relu else h

        h = layer(block_adjs[0], x, params["W1"], params["b1"], True)
        h = layer(block_adjs[1], h, params["W2"], params["b2"], False)

        def cos(e):
            s, d = h[e[0]], h[e[1]]
            num = jnp.sum(s * d, -1, keepdims=True)
            den = (jnp.maximum(jnp.linalg.norm(s, axis=-1, keepdims=True), 1e-8)
                   * jnp.maximum(jnp.linalg.norm(d, axis=-1, keepdims=True), 1e-8))
            return num / den

        return cos(pos_edges), cos(neg_edges)

    pos_m, neg_m = ref_forward(True)    # matches kernel numerics
    pos_f, neg_f = ref_forward(False)   # full-f32 module semantics

    assert jnp.allclose(pos_score, pos_m, atol=3e-3)
    assert jnp.allclose(neg_score, neg_m, atol=3e-3)
    assert jnp.allclose(pos_score, pos_f, atol=6e-2)   # bf16-operand deviation bound
    assert jnp.allclose(neg_score, neg_f, atol=6e-2)
    assert pos_score.shape == (E_POS, 1) and neg_score.shape == (E_NEG, 1)

    print("KERNEL_OK")
</pallas_src>

<mosaic_0001>
module attributes {stable_mosaic.version = 11 : i64} {
  func.func @fused_forward_kernel(%arg0: memref<2x32x32xf32, #tpu.memory_space<vmem>>, %arg1: memref<2x32x32xf32, #tpu.memory_space<vmem>>, %arg2: memref<32x512xf32, #tpu.memory_space<vmem>>, %arg3: memref<1024x256xbf16, #tpu.memory_space<any>>, %arg4: memref<1x256xf32, #tpu.memory_space<vmem>>, %arg5: memref<512x64xbf16, #tpu.memory_space<vmem>>, %arg6: memref<1x64xf32, #tpu.memory_space<vmem>>, %arg7: memref<2x256xi32, #tpu.memory_space<vmem>>, %arg8: memref<1x256xf32, #tpu.memory_space<vmem>>, %arg9: memref<1024x256xbf16, #tpu.memory_space<vmem>>, %arg10: memref<!tpu.dma_semaphore, #tpu.memory_space<semaphore_mem>>) attributes {dimension_semantics = [], scalar_prefetch = 0 : i64, scratch_operands = 2 : i64, tpu.core_type = #tpu.core_type<tc>} {
    tpu.enqueue_dma source(%arg3 : memref<1024x256xbf16, #tpu.memory_space<any>>) target(%arg9 : memref<1024x256xbf16, #tpu.memory_space<vmem>>) target_semaphore(%arg10 : memref<!tpu.dma_semaphore, #tpu.memory_space<semaphore_mem>>)
    %c0 = arith.constant 0 : index
    %c0_0 = arith.constant 0 : index
    %0 = vector.load %arg2[%c0, %c0_0] : memref<32x512xf32, #tpu.memory_space<vmem>>, vector<32x512xf32>
    %1 = arith.truncf %0 : vector<32x512xf32> to vector<32x512xbf16>
    %c0_1 = arith.constant 0 : index
    %c0_2 = arith.constant 0 : index
    %c0_3 = arith.constant 0 : index
    %2 = vector.load %arg0[%c0_1, %c0_2, %c0_3] : memref<2x32x32xf32, #tpu.memory_space<vmem>>, vector<1x32x32xf32>
    %3 = vector.shape_cast %2 : vector<1x32x32xf32> to vector<32x32xf32>
    %4 = arith.truncf %3 : vector<32x32xf32> to vector<32x32xbf16>
    %cst = arith.constant dense<0.000000e+00> : vector<32x512xf32>
    %5 = tpu.matmul %4, %1, %cst {dimension_numbers = #tpu.dot_dimension_numbers<[1], [0], [0], [1], [0, 0, 1, 1], [], []>} : vector<32x32xbf16>, vector<32x512xbf16>, vector<32x512xf32> -> vector<32x512xf32>
    %6 = arith.truncf %5 : vector<32x512xf32> to vector<32x512xbf16>
    %c1 = arith.constant 1 : index
    %c0_4 = arith.constant 0 : index
    %c0_5 = arith.constant 0 : index
    %7 = vector.load %arg0[%c1, %c0_4, %c0_5] : memref<2x32x32xf32, #tpu.memory_space<vmem>>, vector<1x32x32xf32>
    %8 = vector.shape_cast %7 : vector<1x32x32xf32> to vector<32x32xf32>
    %9 = arith.truncf %8 : vector<32x32xf32> to vector<32x32xbf16>
    %cst_6 = arith.constant dense<0.000000e+00> : vector<32x512xf32>
    %10 = tpu.matmul %9, %1, %cst_6 {dimension_numbers = #tpu.dot_dimension_numbers<[1], [0], [0], [1], [0, 0, 1, 1], [], []>} : vector<32x32xbf16>, vector<32x512xbf16>, vector<32x512xf32> -> vector<32x512xf32>
    %11 = arith.truncf %10 : vector<32x512xf32> to vector<32x512xbf16>
    tpu.wait_dma2 semaphore(%arg10 : memref<!tpu.dma_semaphore, #tpu.memory_space<semaphore_mem>>) src(%arg3 : memref<1024x256xbf16, #tpu.memory_space<any>>) dst(%arg9 : memref<1024x256xbf16, #tpu.memory_space<vmem>>)
    %c0_7 = arith.constant 0 : index
    %c0_8 = arith.constant 0 : index
    %12 = vector.load %arg9[%c0_7, %c0_8] : memref<1024x256xbf16, #tpu.memory_space<vmem>>, vector<512x256xbf16>
    %cst_9 = arith.constant dense<0.000000e+00> : vector<32x256xf32>
    %13 = tpu.matmul %6, %12, %cst_9 {dimension_numbers = #tpu.dot_dimension_numbers<[1], [0], [0], [1], [0, 0, 1, 1], [], []>} : vector<32x512xbf16>, vector<512x256xbf16>, vector<32x256xf32> -> vector<32x256xf32>
    %c512 = arith.constant 512 : index
    %c0_10 = arith.constant 0 : index
    %14 = vector.load %arg9[%c512, %c0_10] : memref<1024x256xbf16, #tpu.memory_space<vmem>>, vector<512x256xbf16>
    %cst_11 = arith.constant dense<0.000000e+00> : vector<32x256xf32>
    %15 = tpu.matmul %11, %14, %cst_11 {dimension_numbers = #tpu.dot_dimension_numbers<[1], [0], [0], [1], [0, 0, 1, 1], [], []>} : vector<32x512xbf16>, vector<512x256xbf16>, vector<32x256xf32> -> vector<32x256xf32>
    %16 = arith.addf %13, %15 : vector<32x256xf32>
    %c0_12 = arith.constant 0 : index
    %c0_13 = arith.constant 0 : index
    %17 = vector.load %arg4[%c0_12, %c0_13] : memref<1x256xf32, #tpu.memory_space<vmem>>, vector<1x256xf32>
    %18 = vector.broadcast %17 : vector<1x256xf32> to vector<32x256xf32>
    %19 = arith.addf %16, %18 : vector<32x256xf32>
    %cst_14 = arith.constant 0.000000e+00 : f32
    %20 = vector.broadcast %cst_14 : f32 to vector<32x256xf32>
    %21 = arith.maximumf %19, %20 : vector<32x256xf32>
    %22 = arith.truncf %21 : vector<32x256xf32> to vector<32x256xbf16>
    %c0_15 = arith.constant 0 : index
    %c0_16 = arith.constant 0 : index
    %c0_17 = arith.constant 0 : index
    %23 = vector.load %arg1[%c0_15, %c0_16, %c0_17] : memref<2x32x32xf32, #tpu.memory_space<vmem>>, vector<1x32x32xf32>
    %24 = vector.shape_cast %23 : vector<1x32x32xf32> to vector<32x32xf32>
    %25 = arith.truncf %24 : vector<32x32xf32> to vector<32x32xbf16>
    %cst_18 = arith.constant dense<0.000000e+00> : vector<32x256xf32>
    %26 = tpu.matmul %25, %22, %cst_18 {dimension_numbers = #tpu.dot_dimension_numbers<[1], [0], [0], [1], [0, 0, 1, 1], [], []>} : vector<32x32xbf16>, vector<32x256xbf16>, vector<32x256xf32> -> vector<32x256xf32>
    %27 = arith.truncf %26 : vector<32x256xf32> to vector<32x256xbf16>
    %c1_19 = arith.constant 1 : index
    %c0_20 = arith.constant 0 : index
    %c0_21 = arith.constant 0 : index
    %28 = vector.load %arg1[%c1_19, %c0_20, %c0_21] : memref<2x32x32xf32, #tpu.memory_space<vmem>>, vector<1x32x32xf32>
    %29 = vector.shape_cast %28 : vector<1x32x32xf32> to vector<32x32xf32>
    %30 = arith.truncf %29 : vector<32x32xf32> to vector<32x32xbf16>
    %cst_22 = arith.constant dense<0.000000e+00> : vector<32x256xf32>
    %31 = tpu.matmul %30, %22, %cst_22 {dimension_numbers = #tpu.dot_dimension_numbers<[1], [0], [0], [1], [0, 0, 1, 1], [], []>} : vector<32x32xbf16>, vector<32x256xbf16>, vector<32x256xf32> -> vector<32x256xf32>
    %32 = arith.truncf %31 : vector<32x256xf32> to vector<32x256xbf16>
    %c0_23 = arith.constant 0 : index
    %c0_24 = arith.constant 0 : index
    %33 = vector.load %arg5[%c0_23, %c0_24] : memref<512x64xbf16, #tpu.memory_space<vmem>>, vector<256x64xbf16>
    %cst_25 = arith.constant dense<0.000000e+00> : vector<32x64xf32>
    %34 = tpu.matmul %27, %33, %cst_25 {dimension_numbers = #tpu.dot_dimension_numbers<[1], [0], [0], [1], [0, 0, 1, 1], [], []>} : vector<32x256xbf16>, vector<256x64xbf16>, vector<32x64xf32> -> vector<32x64xf32>
    %c256 = arith.constant 256 : index
    %c0_26 = arith.constant 0 : index
    %35 = vector.load %arg5[%c256, %c0_26] : memref<512x64xbf16, #tpu.memory_space<vmem>>, vector<256x64xbf16>
    %cst_27 = arith.constant dense<0.000000e+00> : vector<32x64xf32>
    %36 = tpu.matmul %32, %35, %cst_27 {dimension_numbers = #tpu.dot_dimension_numbers<[1], [0], [0], [1], [0, 0, 1, 1], [], []>} : vector<32x256xbf16>, vector<256x64xbf16>, vector<32x64xf32> -> vector<32x64xf32>
    %37 = arith.addf %34, %36 : vector<32x64xf32>
    %c0_28 = arith.constant 0 : index
    %c0_29 = arith.constant 0 : index
    %38 = vector.load %arg6[%c0_28, %c0_29] : memref<1x64xf32, #tpu.memory_space<vmem>>, vector<1x64xf32>
    %39 = vector.broadcast %38 : vector<1x64xf32> to vector<32x64xf32>
    %40 = arith.addf %37, %39 : vector<32x64xf32>
    %cst_30 = arith.constant dense<0.000000e+00> : vector<32x32xf32>
    %41 = tpu.matmul %40, %40, %cst_30 {dimension_numbers = #tpu.dot_dimension_numbers<[1], [1], [0], [0], [0, 0, 1, 0], [], []>} : vector<32x64xf32>, vector<32x64xf32>, vector<32x32xf32> -> vector<32x32xf32>
    %42 = arith.mulf %40, %40 : vector<32x64xf32>
    %cst_31 = arith.constant dense<0.000000e+00> : vector<32xf32>
    %43 = vector.multi_reduction <add>, %42, %cst_31 [1] : vector<32x64xf32> to vector<32xf32>
    %44 = vector.shape_cast %43 : vector<32xf32> to vector<32x1xf32>
    %45 = tpu.iota {dimensions = array<i32: 0>} : vector<32x256xi32>
    %c0_32 = arith.constant 0 : index
    %c0_33 = arith.constant 0 : index
    %46 = vector.load %arg7[%c0_32, %c0_33] : memref<2x256xi32, #tpu.memory_space<vmem>>, vector<1x256xi32>
    %47 = vector.broadcast %46 : vector<1x256xi32> to vector<32x256xi32>
    %48 = arith.cmpi eq, %45, %47 : vector<32x256xi32>
    %49 = arith.extui %48 : vector<32x256xi1> to vector<32x256xi32>
    %50 = arith.sitofp %49 : vector<32x256xi32> to vector<32x256xf32>
    %c1_34 = arith.constant 1 : index
    %c0_35 = arith.constant 0 : index
    %51 = vector.load %arg7[%c1_34, %c0_35] : memref<2x256xi32, #tpu.memory_space<vmem>>, vector<1x256xi32>
    %52 = vector.broadcast %51 : vector<1x256xi32> to vector<32x256xi32>
    %53 = arith.cmpi eq, %45, %52 : vector<32x256xi32>
    %54 = arith.extui %53 : vector<32x256xi1> to vector<32x256xi32>
    %55 = arith.sitofp %54 : vector<32x256xi32> to vector<32x256xf32>
    %cst_36 = arith.constant dense<0.000000e+00> : vector<32x256xf32>
    %56 = tpu.matmul %41, %55, %cst_36 {dimension_numbers = #tpu.dot_dimension_numbers<[1], [0], [0], [1], [0, 0, 1, 1], [], []>} : vector<32x32xf32>, vector<32x256xf32>, vector<32x256xf32> -> vector<32x256xf32>
    %57 = arith.mulf %50, %56 : vector<32x256xf32>
    %cst_37 = arith.constant dense<0.000000e+00> : vector<256xf32>
    %58 = vector.multi_reduction <add>, %57, %cst_37 [0] : vector<32x256xf32> to vector<256xf32>
    %59 = vector.shape_cast %58 : vector<256xf32> to vector<1x256xf32>
    %60 = vector.broadcast %44 : vector<32x1xf32> to vector<32x256xf32>
    %61 = arith.mulf %50, %60 : vector<32x256xf32>
    %cst_38 = arith.constant dense<0.000000e+00> : vector<256xf32>
    %62 = vector.multi_reduction <add>, %61, %cst_38 [0] : vector<32x256xf32> to vector<256xf32>
    %63 = vector.shape_cast %62 : vector<256xf32> to vector<1x256xf32>
    %64 = vector.broadcast %44 : vector<32x1xf32> to vector<32x256xf32>
    %65 = arith.mulf %55, %64 : vector<32x256xf32>
    %cst_39 = arith.constant dense<0.000000e+00> : vector<256xf32>
    %66 = vector.multi_reduction <add>, %65, %cst_39 [0] : vector<32x256xf32> to vector<256xf32>
    %67 = vector.shape_cast %66 : vector<256xf32> to vector<1x256xf32>
    %cst_40 = arith.constant 1.000000e-16 : f32
    %68 = vector.broadcast %cst_40 : f32 to vector<1x256xf32>
    %69 = arith.maximumf %63, %68 : vector<1x256xf32>
    %70 = math.rsqrt %69 : vector<1x256xf32>
    %71 = arith.mulf %59, %70 : vector<1x256xf32>
    %cst_41 = arith.constant 1.000000e-16 : f32
    %72 = vector.broadcast %cst_41 : f32 to vector<1x256xf32>
    %73 = arith.maximumf %67, %72 : vector<1x256xf32>
    %74 = math.rsqrt %73 : vector<1x256xf32>
    %75 = arith.mulf %71, %74 : vector<1x256xf32>
    %c0_42 = arith.constant 0 : index
    %c0_43 = arith.constant 0 : index
    %76 = vector.load %arg8[%c0_42, %c0_43] : memref<1x256xf32, #tpu.memory_space<vmem>>, vector<1x256xf32>
    tpu.vector_store %arg8[%c0_42, %c0_43], %75 {strides = array<i32>} : memref<1x256xf32, #tpu.memory_space<vmem>>, vector<1x256xf32>,
    return
  }
}

</mosaic_0001>

<bundles_post_ra>
// kernel: double_gcn_cos_forward.1
= control target key start
LH: loop header
LB: loop body
LE: loop exit
PB: predicated region body
PF: predicated region fallthrough
CT: control target
= control target key end

     0   :  { %vm71_vm0 = vcmask 261120   ;;  %s3067_s10 = smov [#allocation2]   ;;  %s3583_s2 = inlined_call_operand.vmem [shape: f32[32,512], index: 2, kind: input, shape index: {}]   ;;  %s3584_s0 = inlined_call_operand.vmem [shape: f32[2,32,32], index: 0, kind: input, shape index: {}]   ;;  %s3585_s3 = inlined_call_operand.hbm [shape: bf16[1024,256], index: 3, kind: input, shape index: {}]   ;;  %s3586_s1 = inlined_call_operand.vmem [shape: f32[2,32,32], index: 1, kind: input, shape index: {}]   ;;  %s3587_s4 = inlined_call_operand.vmem [shape: f32[1,256], index: 4, kind: input, shape index: {}]   ;;  %s3588_s5 = inlined_call_operand.vmem [shape: bf16[512,64], index: 5, kind: input, shape index: {}]   ;;  %s3589_s6 = inlined_call_operand.vmem [shape: f32[1,64], index: 6, kind: input, shape index: {}]   ;;  %s3590_s7 = inlined_call_operand.vmem [shape: s32[2,256], index: 7, kind: input, shape index: {}]   ;;  %s3591_s8 = inlined_call_operand.vmem [shape: f32[1,256], index: 8, kind: output, shape index: {}]  }
   0x1   :  { %v49_v0 = vld [vmem:[%s3583_s2 + $0x40] sm:$0xff]  ;;  %v67_v5 = vld [vmem:[%s3584_s0 + $0x10] sm:$0xff]  ;;  %v68_v6 = vld [vmem:[%s3584_s0 + $0x18] sm:$0xff]  ;;  %s37_s11 = sshll.u32 %s3067_s10, 4  ;;  %s38_s11 = int_to_ptr.vmem [resolvable:$true] %s37_s11 }
   0x2   :  { %v53_v1 = vld [vmem:[%s3583_s2 + $0x60] sm:$0xff]  ;;  %v52_v7 = vld [vmem:[%s3583_s2 + $0x58] sm:$0xff]  ;;  %v51_v9 = vld [vmem:[%s3583_s2 + $0x50] sm:$0xff]  ;;  %v70_v22 = vpack.c.bf16 %v68_v6, %v67_v5 }
   0x3   :  { %v41_v2 = vld [vmem:[%s3583_s2] sm:$0xff]  ;;  %v61_v3 = vpack.c.bf16 %v53_v1, %v49_v0  ;;  %v56_v8 = vld [vmem:[%s3583_s2 + $0x78] sm:$0xff]  ;;  %v55_v11 = vld [vmem:[%s3583_s2 + $0x70] sm:$0xff] }
   0x4   :  { %v45_v4 = vld [vmem:[%s3583_s2 + $0x20] sm:$0xff]  ;;  %v43_v12 = vld [vmem:[%s3583_s2 + $0x10] sm:$0xff]  ;;  %v64_v14 = vpack.c.bf16 %v56_v8, %v52_v7  ;;  %v63_v15 = vpack.c.bf16 %v55_v11, %v51_v9  ;;  %v50_v16 = vld [vmem:[%s3583_s2 + $0x48] sm:$0xff] }
   0x5   :  { %3019 = vmatpush.bf16.msra.mxu3 %v61_v3  ;;  %v57_v10 = vpack.c.bf16 %v45_v4, %v41_v2  ;;  %v47_v13 = vld [vmem:[%s3583_s2 + $0x30] sm:$0xff]  ;;  %84 = vmatpush.bf16.msra.mxu0 %v61_v3  ;;  %v54_v17 = vld [vmem:[%s3583_s2 + $0x68] sm:$0xff]  ;;  %v65_v19 = vld [vmem:[%s3584_s0] sm:$0xff] }
   0x6   :  { %v62_v18 = vpack.c.bf16 %v54_v17, %v50_v16  ;;  %v44_v20 = vld [vmem:[%s3583_s2 + $0x18] sm:$0xff]  ;;  %122 = vmatpush.bf16.msra.mxu2 %v63_v15  ;;  %v59_v23 = vpack.c.bf16 %v47_v13, %v43_v12  ;;  %v66_v24 = vld [vmem:[%s3584_s0 + $0x8] sm:$0xff]  ;;  %v2153_v30 = vld [vmem:[%s3584_s0 + $0x20] sm:$0xff] }
   0x7   :  { %v48_v21 = vld [vmem:[%s3583_s2 + $0x38] sm:$0xff]  ;;  %v42_v25 = vld [vmem:[%s3583_s2 + $0x8] sm:$0xff]  ;;  %v69_v29 = vpack.c.bf16 %v66_v24, %v65_v19  ;;  %v2155_v33 = vld [vmem:[%s3584_s0 + $0x30] sm:$0xff] }
   0x8   :  { %v46_v26 = vld [vmem:[%s3583_s2 + $0x28] sm:$0xff]  ;;  %103 = vmatpush.bf16.msra.mxu1 %v62_v18  ;;  %v60_v28 = vpack.c.bf16 %v48_v21, %v44_v20  ;;  %v2156_v34 = vld [vmem:[%s3584_s0 + $0x38] sm:$0xff] }
   0x9   :  { %3020 = vmatpush.bf16.msra.mxu3 %v57_v10  ;;  %v58_v27 = vpack.c.bf16 %v46_v26, %v42_v25  ;;  %85 = vmatpush.bf16.msra.mxu0 %v57_v10  ;;  %v2154_v31 = vld [vmem:[%s3584_s0 + $0x28] sm:$0xff]  ;;  %v168_v35 = vpack.c.bf16 %v2156_v34, %v2155_v33  ;;  %s35_s0 = sshll.u32 %s3585_s3, 4  ;;  %s36_s0 = int_to_ptr.hbm [resolvable:$true] %s35_s0 }
   0xa   :  { %123 = vmatpush.bf16.msra.mxu2 %v59_v23  ;;  %v167_v32 = vpack.c.bf16 %v2154_v31, %v2153_v30  ;;  %40 = dma.hbm_to_vmem [thread:$0]  %s36_s0, 16384, %s38_s11, [#allocation3] }
   0xc   :  { %2146 = vmatmul.msk.bf16.vlgmr.msra.gmra.mxu3 %vm71_vm0, %v70_v22  ;;  %104 = vmatpush.bf16.msra.mxu1 %v58_v27 }
   0xd   :  { %141 = vmatpush.bf16.msrb.mxu3 %v64_v14  ;;  %181 = vmatpush.bf16.msrb.mxu0 %v61_v3 }
   0xe   :  { %219 = vmatpush.bf16.msrb.mxu2 %v63_v15  ;;  %2145 = vmatmul.msk.bf16.vlgmr.msra.gmra.mxu0 %vm71_vm0, %v69_v29 }
   0xf   :  { %2149 = vmatmul.msk.bf16.vlgmr.msra.gmra.mxu2 %vm71_vm0, %v69_v29  ;;  %2147 = vmatmul.msk.bf16.vlgmr.msra.gmra.mxu1 %vm71_vm0, %v69_v29 }
  0x10   :  { %200 = vmatpush.bf16.msrb.mxu1 %v62_v18 }
  0x11   :  { %142 = vmatpush.bf16.msrb.mxu3 %v60_v28  ;;  %182 = vmatpush.bf16.msrb.mxu0 %v57_v10 }
  0x12   :  { %220 = vmatpush.bf16.msrb.mxu2 %v59_v23 }
  0x14   :  { %201 = vmatpush.bf16.msrb.mxu1 %v58_v27 }
  0x15   :  { %238 = vmatpush.bf16.msra.mxu3 %v64_v14 }
  0x19   :  { %239 = vmatpush.bf16.msra.mxu3 %v60_v28 }
  0x1c   :  { %2151 = vmatmul.msk.bf16.vlgmr.msrb.gmra.mxu3 %vm71_vm0, %v69_v29 }
  0x1e   :  { %2157 = vmatmul.msk.bf16.vlgmr.msrb.gmra.mxu0 %vm71_vm0, %v167_v32 }
  0x1f   :  { %2150 = vmatmul.msk.bf16.gmra.mxu2 %vm71_vm0, %v70_v22  ;;  %2148 = vmatmul.msk.bf16.gmra.mxu1 %vm71_vm0, %v70_v22 }
  0x2c   :  { %2152 = vmatmul.msk.bf16.gmra.mxu3 %vm71_vm0, %v70_v22 }
  0x2e   :  { %2158 = vmatmul.msk.bf16.gmra.mxu0 %vm71_vm0, %v168_v35 }
  0x2f   :  { %2161 = vmatmul.msk.bf16.vlgmr.msrb.gmra.mxu2 %vm71_vm0, %v167_v32  ;;  %2159 = vmatmul.msk.bf16.vlgmr.msrb.gmra.mxu1 %vm71_vm0, %v167_v32 }
  0x3c   :  { %2163 = vmatmul.msk.bf16.vlgmr.msra.gmra.mxu3 %vm71_vm0, %v167_v32 }
  0x3f   :  { %2162 = vmatmul.msk.bf16.gmra.mxu2 %vm71_vm0, %v168_v35  ;;  %2160 = vmatmul.msk.bf16.gmra.mxu1 %vm71_vm0, %v168_v35 }
  0x4c   :  { %2164 = vmatmul.msk.bf16.gmra.mxu3 %vm71_vm0, %v168_v35 }
  0x8b   :  { %v87_v37 = vpop.f32.mrf.mxu0 }
  0x8c   :  { %v106_v36 = vpop.f32.mrf.mxu1 }
  0x8f   :  { %v92_v38 = vpop.f32.mrf.mxu3 }
  0x92   :  { %v125_v39 = vpop.f32.mrf.mxu2 }
  0x93   :  { %v89_v41 = vpop.f32.mrf.mxu0 }
  0x94   :  { %v108_v40 = vpop.f32.mrf.mxu1  ;;  %v3208_v43 = vpack.c.bf16 %v89_v41, %v87_v37 }
  0x95   :  { %v3206_v42 = vpack.c.bf16 %v108_v40, %v106_v36 }
  0x97   :  { %v94_v44 = vpop.f32.mrf.mxu3 }
  0x98   :  { %v3210_v45 = vpack.c.bf16 %v94_v44, %v92_v38 }
  0x9a   :  { %v127_v46 = vpop.f32.mrf.mxu2 }
  0x9b   :  { %v3212_v47 = vpack.c.bf16 %v127_v46, %v125_v39  ;;  %v184_v49 = vpop.f32.mrf.mxu0 }
  0x9c   :  { %v111_v48 = vpop.f32.mrf.mxu1 }
  0x9f   :  { %v144_v50 = vpop.f32.mrf.mxu3 }
  0xa2   :  { %v130_v51 = vpop.f32.mrf.mxu2 }
  0xa3   :  { %v186_v53 = vpop.f32.mrf.mxu0 }
  0xa4   :  { %v113_v52 = vpop.f32.mrf.mxu1  ;;  %v3216_v55 = vpack.c.bf16 %v186_v53, %v184_v49 }
  0xa5   :  { %v3214_v54 = vpack.c.bf16 %v113_v52, %v111_v48 }
  0xa7   :  { %v146_v56 = vpop.f32.mrf.mxu3 }
  0xa8   :  { %v3218_v57 = vpack.c.bf16 %v146_v56, %v144_v50 }
  0xaa   :  { %v132_v58 = vpop.f32.mrf.mxu2 }
  0xab   :  { %v3220_v59 = vpack.c.bf16 %v132_v58, %v130_v51  ;;  %v189_v61 = vpop.f32.mrf.mxu0 }
  0xac   :  { %v203_v60 = vpop.f32.mrf.mxu1 }
  0xaf   :  { %v149_v62 = vpop.f32.mrf.mxu3 }
  0xb2   :  { %v222_v63 = vpop.f32.mrf.mxu2 }
  0xb3   :  { %v191_v1 = vpop.f32.mrf.mxu0 }
  0xb4   :  { %v205_v0 = vpop.f32.mrf.mxu1  ;;  %v3224_v3 = vpack.c.bf16 %v191_v1, %v189_v61 }
  0xb5   :  { %v3222_v2 = vpack.c.bf16 %v205_v0, %v203_v60 }
  0xb7   :  { %v151_v4 = vpop.f32.mrf.mxu3 }
  0xb8   :  { %v3226_v5 = vpack.c.bf16 %v151_v4, %v149_v62 }
  0xba   :  { %v224_v6 = vpop.f32.mrf.mxu2 }
  0xbb   :  { %v3228_v7 = vpack.c.bf16 %v224_v6, %v222_v63 }
  0xbc   :  { %v208_v8 = vpop.f32.mrf.mxu1 }
  0xbf   :  { %v241_v9 = vpop.f32.mrf.mxu3 }
  0xc2   :  { %v227_v10 = vpop.f32.mrf.mxu2 }
  0xc4   :  { %v210_v11 = vpop.f32.mrf.mxu1 }
  0xc5   :  { %v3230_v12 = vpack.c.bf16 %v210_v11, %v208_v8 }
  0xc7   :  { %v243_v13 = vpop.f32.mrf.mxu3 }
  0xc8   :  { %v3232_v14 = vpack.c.bf16 %v243_v13, %v241_v9 }
  0xca   :  { %v229_v15 = vpop.f32.mrf.mxu2 }
  0xcb   :  { %v3234_v16 = vpack.c.bf16 %v229_v15, %v227_v10 }
  0xcf   :  { %v246_v17 = vpop.f32.mrf.mxu3 }
  0xd7   :  { %v248_v18 = vpop.f32.mrf.mxu3 }
  0xd8   :  { %v3236_v19 = vpack.c.bf16 %v248_v18, %v246_v17 }
  0xd9   :  { %3065 = dma.done.wait [#allocation3], 16384 }
  0xda   :  { %3066 = vsyncadd [#allocation3], 4294950912  ;;  %v2223_v20 = vld [vmem:[#allocation2 + $0x270] sm:$0xf]  ;;  %v2938_v21 = vld [vmem:[#allocation2 + $0x274] sm:$0xf0] }
  0xdb   :  { %v2287_v22 = vld [vmem:[#allocation2 + $0x2f0] sm:$0xf]  ;;  %v2224_v23 = vor.u32 %v2938_v21, %v2223_v20  ;;  %v2954_v24 = vld [vmem:[#allocation2 + $0x2f4] sm:$0xf0]  ;;  %v2215_v31 = vld [vmem:[#allocation2 + $0x260] sm:$0xf] }
  0xdc   :  { %v2351_v25 = vld [vmem:[#allocation2 + $0x370] sm:$0xf]  ;;  %v2970_v26 = vld [vmem:[#allocation2 + $0x374] sm:$0xf0]  ;;  %v2288_v27 = vor.u32 %v2954_v24, %v2287_v22  ;;  %v2936_v33 = vld [vmem:[#allocation2 + $0x264] sm:$0xf0] }
  0xdd   :  { %v2352_v28 = vor.u32 %v2970_v26, %v2351_v25  ;;  %v2415_v29 = vld [vmem:[#allocation2 + $0x3f0] sm:$0xf]  ;;  %v2986_v30 = vld [vmem:[#allocation2 + $0x3f4] sm:$0xf0]  ;;  %711 = vmatpush.bf16.msra.mxu0 %v2224_v23  ;;  %v2279_v34 = vld [vmem:[#allocation2 + $0x2e0] sm:$0xf]  ;;  %v2216_v36 = vor.u32 %v2936_v33, %v2215_v31 }
  0xde   :  { %v2416_v32 = vor.u32 %v2986_v30, %v2415_v29  ;;  %v2952_v35 = vld [vmem:[#allocation2 + $0x2e4] sm:$0xf0]  ;;  %730 = vmatpush.bf16.msra.mxu1 %v2288_v27  ;;  %v2343_v38 = vld [vmem:[#allocation2 + $0x360] sm:$0xf]  ;;  %v2207_v46 = vld [vmem:[#allocation2 + $0x250] sm:$0xf] }
  0xdf   :  { %749 = vmatpush.bf16.msra.mxu2 %v2352_v28  ;;  %v2280_v37 = vor.u32 %v2952_v35, %v2279_v34  ;;  %v2968_v39 = vld [vmem:[#allocation2 + $0x364] sm:$0xf0]  ;;  %v2407_v40 = vld [vmem:[#allocation2 + $0x3e0] sm:$0xf]  ;;  %v2934_v48 = vld [vmem:[#allocation2 + $0x254] sm:$0xf0] }
  0xe0   :  { %768 = vmatpush.bf16.msrb.mxu3 %v2416_v32  ;;  %v2344_v41 = vor.u32 %v2968_v39, %v2343_v38  ;;  %v2984_v44 = vld [vmem:[#allocation2 + $0x3e4] sm:$0xf0]  ;;  %v2271_v50 = vld [vmem:[#allocation2 + $0x2d0] sm:$0xf]  ;;  %v2950_v51 = vld [vmem:[#allocation2 + $0x2d4] sm:$0xf0]  ;;  %v2208_v53 = vor.u32 %v2934_v48, %v2207_v46 }
  0xe1   :  { %v2408_v49 = vor.u32 %v2984_v44, %v2407_v40  ;;  %v2335_v52 = vld [vmem:[#allocation2 + $0x350] sm:$0xf]  ;;  %712 = vmatpush.bf16.msra.mxu0 %v2216_v36  ;;  %v2966_v56 = vld [vmem:[#allocation2 + $0x354] sm:$0xf0]  ;;  %v2272_v61 = vor.u32 %v2950_v51, %v2271_v50  ;;  %v2199_v63 = vld [vmem:[#allocation2 + $0x240] sm:$0xf] }
  0xe2   :  { %v2399_v58 = vld [vmem:[#allocation2 + $0x3d0] sm:$0xf]  ;;  %v2982_v60 = vld [vmem:[#allocation2 + $0x3d4] sm:$0xf0]  ;;  %731 = vmatpush.bf16.msra.mxu1 %v2280_v37  ;;  %v2336_v62 = vor.u32 %v2966_v56, %v2335_v52  ;;  %v2932_v0 = vld [vmem:[#allocation2 + $0x244] sm:$0xf0] }
  0xe3   :  { %750 = vmatpush.bf16.msra.mxu2 %v2344_v41  ;;  %v2263_v1 = vld [vmem:[#allocation2 + $0x2c0] sm:$0xf]  ;;  %v2400_v4 = vor.u32 %v2982_v60, %v2399_v58  ;;  %v2948_v6 = vld [vmem:[#allocation2 + $0x2c4] sm:$0xf0]  ;;  %v2200_v13 = vor.u32 %v2932_v0, %v2199_v63  ;;  %v2191_v18 = vld [vmem:[#allocation2 + $0x230] sm:$0xf] }
  0xe4   :  { %769 = vmatpush.bf16.msrb.mxu3 %v2408_v49  ;;  %v2327_v8 = vld [vmem:[#allocation2 + $0x340] sm:$0xf]  ;;  %v2964_v9 = vld [vmem:[#allocation2 + $0x344] sm:$0xf0]  ;;  %v2264_v15 = vor.u32 %v2948_v6, %v2263_v1  ;;  %v2930_v20 = vld [vmem:[#allocation2 + $0x234] sm:$0xf0] }
  0xe5   :  { %v2391_v10 = vld [vmem:[#allocation2 + $0x3c0] sm:$0xf]  ;;  %v2980_v11 = vld [vmem:[#allocation2 + $0x3c4] sm:$0xf0]  ;;  %713 = vmatpush.bf16.msra.mxu0 %v2208_v53  ;;  %v2328_v17 = vor.u32 %v2964_v9, %v2327_v8  ;;  %v2255_v21 = vld [vmem:[#allocation2 + $0x2b0] sm:$0xf]  ;;  %v2192_v28 = vor.u32 %v2930_v20, %v2191_v18 }
  0xe6   :  { %732 = vmatpush.bf16.msra.mxu1 %v2272_v61  ;;  %v2392_v22 = vor.u32 %v2980_v11, %v2391_v10  ;;  %v2946_v23 = vld [vmem:[#allocation2 + $0x2b4] sm:$0xf0]  ;;  %v2319_v24 = vld [vmem:[#allocation2 + $0x330] sm:$0xf]  ;;  %v2183_v31 = vld [vmem:[#allocation2 + $0x220] sm:$0xf] }
  0xe7   :  { %751 = vmatpush.bf16.msra.mxu2 %v2336_v62  ;;  %v2962_v25 = vld [vmem:[#allocation2 + $0x334] sm:$0xf0]  ;;  %v2383_v26 = vld [vmem:[#allocation2 + $0x3b0] sm:$0xf]  ;;  %v2256_v29 = vor.u32 %v2946_v23, %v2255_v21  ;;  %v2928_v32 = vld [vmem:[#allocation2 + $0x224] sm:$0xf0] }
  0xe8   :  { %770 = vmatpush.bf16.msrb.mxu3 %v2400_v4  ;;  %v2978_v27 = vld [vmem:[#allocation2 + $0x3b4] sm:$0xf0]  ;;  %v2320_v30 = vor.u32 %v2962_v25, %v2319_v24  ;;  %v2247_v33 = vld [vmem:[#allocation2 + $0x2a0] sm:$0xf]  ;;  %v2944_v35 = vld [vmem:[#allocation2 + $0x2a4] sm:$0xf0]  ;;  %v2184_v40 = vor.u32 %v2928_v32, %v2183_v31 }
  0xe9   :  { %714 = vmatpush.bf16.msra.mxu0 %v2200_v13  ;;  %v2384_v34 = vor.u32 %v2978_v27, %v2383_v26  ;;  %v2311_v36 = vld [vmem:[#allocation2 + $0x320] sm:$0xf]  ;;  %v2960_v37 = vld [vmem:[#allocation2 + $0x324] sm:$0xf0]  ;;  %v2248_v41 = vor.u32 %v2944_v35, %v2247_v33  ;;  %v2175_v46 = vld [vmem:[#allocation2 + $0x210] sm:$0xf] }
  0xea   :  { %733 = vmatpush.bf16.msra.mxu1 %v2264_v15  ;;  %v2375_v38 = vld [vmem:[#allocation2 + $0x3a0] sm:$0xf]  ;;  %v2976_v39 = vld [vmem:[#allocation2 + $0x3a4] sm:$0xf0]  ;;  %v2312_v44 = vor.u32 %v2960_v37, %v2311_v36  ;;  %v2926_v48 = vld [vmem:[#allocation2 + $0x214] sm:$0xf0] }
  0xeb   :  { %752 = vmatpush.bf16.msra.mxu2 %v2328_v17  ;;  %v2239_v49 = vld [vmem:[#allocation2 + $0x290] sm:$0xf]  ;;  %v2376_v50 = vor.u32 %v2976_v39, %v2375_v38  ;;  %v2942_v51 = vld [vmem:[#allocation2 + $0x294] sm:$0xf0]  ;;  %v2176_v60 = vor.u32 %v2926_v48, %v2175_v46  ;;  %v2167_v61 = vld [vmem:[#allocation2 + $0x200] sm:$0xf] }
  0xec   :  { %771 = vmatpush.bf16.msrb.mxu3 %v2392_v22  ;;  %v2303_v52 = vld [vmem:[#allocation2 + $0x310] sm:$0xf]  ;;  %v2958_v53 = vld [vmem:[#allocation2 + $0x314] sm:$0xf0]  ;;  %v2240_v62 = vor.u32 %v2942_v51, %v2239_v49  ;;  %v2924_v0 = vld [vmem:[#allocation2 + $0x204] sm:$0xf0] }
  0xed   :  { %715 = vmatpush.bf16.msra.mxu0 %v2192_v28  ;;  %v2367_v56 = vld [vmem:[#allocation2 + $0x390] sm:$0xf]  ;;  %v2974_v58 = vld [vmem:[#allocation2 + $0x394] sm:$0xf0]  ;;  %v2304_v63 = vor.u32 %v2958_v53, %v2303_v52  ;;  %v2231_v1 = vld [vmem:[#allocation2 + $0x280] sm:$0xf]  ;;  %v2168_v17 = vor.u32 %v2924_v0, %v2167_v61 }
  0xee   :  { %734 = vmatpush.bf16.msra.mxu1 %v2256_v29  ;;  %v2940_v4 = vld [vmem:[#allocation2 + $0x284] sm:$0xf0]  ;;  %v2368_v6 = vor.u32 %v2974_v58, %v2367_v56  ;;  %v2295_v8 = vld [vmem:[#allocation2 + $0x300] sm:$0xf]  ;;  %v2937_v13 = vld [vmem:[#allocation2 + $0x274] sm:$0xf] }
  0xef   :  { %753 = vmatpush.bf16.msra.mxu2 %v2320_v30  ;;  %v2956_v9 = vld [vmem:[#allocation2 + $0x304] sm:$0xf0]  ;;  %v2359_v10 = vld [vmem:[#allocation2 + $0x380] sm:$0xf]  ;;  %v2225_v15 = vld [vmem:[#allocation2 + $0x278] sm:$0xf0]  ;;  %v2232_v21 = vor.u32 %v2940_v4, %v2231_v1 }
  0xf0   :  { %772 = vmatpush.bf16.msrb.mxu3 %v2384_v34  ;;  %v2972_v11 = vld [vmem:[#allocation2 + $0x384] sm:$0xf0]  ;;  %v2953_v18 = vld [vmem:[#allocation2 + $0x2f4] sm:$0xf]  ;;  %v2289_v20 = vld [vmem:[#allocation2 + $0x2f8] sm:$0xf0]  ;;  %v2296_v22 = vor.u32 %v2956_v9, %v2295_v8  ;;  %v2228_v24 = vor.u32 %v2937_v13, %v2225_v15 }
  0xf1   :  { %716 = vmatpush.bf16.msra.mxu0 %v2184_v40  ;;  %v2360_v23 = vor.u32 %v2972_v11, %v2359_v10  ;;  %v2969_v25 = vld [vmem:[#allocation2 + $0x374] sm:$0xf]  ;;  %v2353_v26 = vld [vmem:[#allocation2 + $0x378] sm:$0xf0]  ;;  %v2292_v28 = vor.u32 %v2953_v18, %v2289_v20  ;;  %v2935_v30 = vld [vmem:[#allocation2 + $0x264] sm:$0xf] }
  0xf2   :  { %735 = vmatpush.bf16.msra.mxu1 %v2248_v41  ;;  %v2985_v27 = vld [vmem:[#allocation2 + $0x3f4] sm:$0xf]  ;;  %v2417_v29 = vld [vmem:[#allocation2 + $0x3f8] sm:$0xf0]  ;;  %v2217_v31 = vld [vmem:[#allocation2 + $0x268] sm:$0xf0]  ;;  %v2356_v34 = vor.u32 %v2969_v25, %v2353_v26 }
  0xf3   :  { %754 = vmatpush.bf16.msra.mxu2 %v2312_v44  ;;  %v2951_v32 = vld [vmem:[#allocation2 + $0x2e4] sm:$0xf]  ;;  %v2281_v33 = vld [vmem:[#allocation2 + $0x2e8] sm:$0xf0]  ;;  %v2420_v35 = vor.u32 %v2985_v27, %v2417_v29  ;;  %v2220_v36 = vor.u32 %v2935_v30, %v2217_v31  ;;  %v2933_v44 = vld [vmem:[#allocation2 + $0x254] sm:$0xf] }
  0xf4   :  { %773 = vmatpush.bf16.msrb.mxu3 %v2376_v50  ;;  %v2967_v37 = vld [vmem:[#allocation2 + $0x364] sm:$0xf]  ;;  %v2345_v38 = vld [vmem:[#allocation2 + $0x368] sm:$0xf0]  ;;  %v2284_v40 = vor.u32 %v2951_v32, %v2281_v33  ;;  %v2209_v46 = vld [vmem:[#allocation2 + $0x258] sm:$0xf0] }
  0xf5   :  { %717 = vmatpush.bf16.msra.mxu0 %v2176_v60  ;;  %v2983_v39 = vld [vmem:[#allocation2 + $0x3e4] sm:$0xf]  ;;  %v2409_v41 = vld [vmem:[#allocation2 + $0x3e8] sm:$0xf0]  ;;  %v2949_v48 = vld [vmem:[#allocation2 + $0x2d4] sm:$0xf]  ;;  %v2348_v50 = vor.u32 %v2967_v37, %v2345_v38  ;;  %v2212_v52 = vor.u32 %v2933_v44, %v2209_v46 }
  0xf6   :  { %736 = vmatpush.bf16.msra.mxu1 %v2240_v62  ;;  %v2273_v49 = vld [vmem:[#allocation2 + $0x2d8] sm:$0xf0]  ;;  %v2412_v51 = vor.u32 %v2983_v39, %v2409_v41  ;;  %v2965_v53 = vld [vmem:[#allocation2 + $0x354] sm:$0xf]  ;;  %v2931_v62 = vld [vmem:[#allocation2 + $0x244] sm:$0xf] }
  0xf7   :  { %755 = vmatpush.bf16.msra.mxu2 %v2304_v63  ;;  %v2337_v56 = vld [vmem:[#allocation2 + $0x358] sm:$0xf0]  ;;  %v2981_v58 = vld [vmem:[#allocation2 + $0x3d4] sm:$0xf]  ;;  %v2276_v60 = vor.u32 %v2949_v48, %v2273_v49  ;;  %v2201_v63 = vld [vmem:[#allocation2 + $0x248] sm:$0xf0] }
  0xf8   :  { %774 = vmatpush.bf16.msrb.mxu3 %v2368_v6  ;;  %v2401_v61 = vld [vmem:[#allocation2 + $0x3d8] sm:$0xf0]  ;;  %v2947_v0 = vld [vmem:[#allocation2 + $0x2c4] sm:$0xf]  ;;  %v2265_v1 = vld [vmem:[#allocation2 + $0x2c8] sm:$0xf0]  ;;  %v2340_v4 = vor.u32 %v2965_v53, %v2337_v56  ;;  %v2204_v8 = vor.u32 %v2931_v62, %v2201_v63 }
  0xf9   :  { %718 = vmatpush.bf16.msra.mxu0 %v2168_v17  ;;  %v2404_v6 = vor.u32 %v2981_v58, %v2401_v61  ;;  %v2963_v9 = vld [vmem:[#allocation2 + $0x344] sm:$0xf]  ;;  %v2329_v10 = vld [vmem:[#allocation2 + $0x348] sm:$0xf0]  ;;  %v2268_v13 = vor.u32 %v2947_v0, %v2265_v1  ;;  %v2929_v17 = vld [vmem:[#allocation2 + $0x234] sm:$0xf] }
  0xfa   :  { %737 = vmatpush.bf16.msra.mxu1 %v2232_v21  ;;  %v2979_v11 = vld [vmem:[#allocation2 + $0x3c4] sm:$0xf]  ;;  %v2393_v15 = vld [vmem:[#allocation2 + $0x3c8] sm:$0xf0]  ;;  %v2193_v18 = vld [vmem:[#allocation2 + $0x238] sm:$0xf0] }
  0xfb   :  { %756 = vmatpush.bf16.msra.mxu2 %v2296_v22  ;;  %v2945_v20 = vld [vmem:[#allocation2 + $0x2b4] sm:$0xf]  ;;  %v2257_v21 = vld [vmem:[#allocation2 + $0x2b8] sm:$0xf0]  ;;  %v2332_v22 = vor.u32 %v2963_v9, %v2329_v10  ;;  %v2927_v30 = vld [vmem:[#allocation2 + $0x224] sm:$0xf] }
  0xfc   :  { %775 = vmatpush.bf16.msrb.mxu3 %v2360_v23  ;;  %719 = vmatmul.bf16.vlgmr.msra.gmra.mxu0 %v3216_v55  ;;  %v2396_v23 = vor.u32 %v2979_v11, %v2393_v15  ;;  %v2961_v25 = vld [vmem:[#allocation2 + $0x334] sm:$0xf]  ;;  %v2321_v26 = vld [vmem:[#allocation2 + $0x338] sm:$0xf0]  ;;  %v2185_v31 = vld [vmem:[#allocation2 + $0x228] sm:$0xf0] }
  0xfd   :  { %787 = vmatpush.bf16.msrb.mxu0 %v2228_v24  ;;  %738 = vmatmul.bf16.vlgmr.msra.gmra.mxu1 %v3222_v2  ;;  %v2196_v24 = vor.u32 %v2929_v17, %v2193_v18  ;;  %v2977_v27 = vld [vmem:[#allocation2 + $0x3b4] sm:$0xf]  ;;  %v2385_v29 = vld [vmem:[#allocation2 + $0x3b8] sm:$0xf0]  ;;  %v2943_v32 = vld [vmem:[#allocation2 + $0x2a4] sm:$0xf] }
  0xfe   :  { %806 = vmatpush.bf16.msrb.mxu1 %v2292_v28  ;;  %757 = vmatmul.bf16.vlgmr.msra.gmra.mxu2 %v3228_v7  ;;  %v2260_v28 = vor.u32 %v2945_v20, %v2257_v21  ;;  %v2249_v33 = vld [vmem:[#allocation2 + $0x2a8] sm:$0xf0]  ;;  %v2959_v37 = vld [vmem:[#allocation2 + $0x324] sm:$0xf]  ;;  %v2925_v44 = vld [vmem:[#allocation2 + $0x214] sm:$0xf] }
  0xff   :  { %776 = vmatmul.bf16.vlgmr.msrb.gmra.mxu3 %v3232_v14  ;;  %825 = vmatpush.bf16.msrb.mxu2 %v2356_v34  ;;  %v2324_v34 = vor.u32 %v2961_v25, %v2321_v26  ;;  %v2313_v38 = vld [vmem:[#allocation2 + $0x328] sm:$0xf0]  ;;  %v2975_v39 = vld [vmem:[#allocation2 + $0x3a4] sm:$0xf]  ;;  %v2177_v46 = vld [vmem:[#allocation2 + $0x218] sm:$0xf0] }
 0x100   :  { %844 = vmatpush.bf16.msra.mxu3 %v2420_v35  ;;  %v2388_v35 = vor.u32 %v2977_v27, %v2385_v29  ;;  %v2377_v41 = vld [vmem:[#allocation2 + $0x3a8] sm:$0xf0]  ;;  %v2941_v48 = vld [vmem:[#allocation2 + $0x294] sm:$0xf]  ;;  %v2241_v49 = vld [vmem:[#allocation2 + $0x298] sm:$0xf0]  ;;  %v2180_v53 = vor.u32 %v2925_v44, %v2177_v46 }
 0x101   :  { %788 = vmatpush.bf16.msrb.mxu0 %v2220_v36  ;;  %v2188_v36 = vor.u32 %v2927_v30, %v2185_v31  ;;  %v2305_v56 = vld [vmem:[#allocation2 + $0x318] sm:$0xf0]  ;;  %v2973_v58 = vld [vmem:[#allocation2 + $0x394] sm:$0xf]  ;;  %v2244_v61 = vor.u32 %v2941_v48, %v2241_v49  ;;  %v2923_v62 = vld [vmem:[#allocation2 + $0x204] sm:$0xf] }
 0x102   :  { %807 = vmatpush.bf16.msrb.mxu1 %v2284_v40  ;;  %v2252_v40 = vor.u32 %v2943_v32, %v2249_v33  ;;  %v2169_v63 = vld [vmem:[#allocation2 + $0x208] sm:$0xf0]  ;;  %v2939_v0 = vld [vmem:[#allocation2 + $0x284] sm:$0xf]  ;;  %v2543_v9 = vld [vmem:[#allocation2 + $0xf0] sm:$0xf] }
 0x103   :  { %826 = vmatpush.bf16.msrb.mxu2 %v2348_v50  ;;  %v2316_v50 = vor.u32 %v2959_v37, %v2313_v38  ;;  %v2233_v1 = vld [vmem:[#allocation2 + $0x288] sm:$0xf0]  ;;  %v2890_v10 = vld [vmem:[#allocation2 + $0xf4] sm:$0xf0]  ;;  %v2955_v15 = vld [vmem:[#allocation2 + $0x304] sm:$0xf] }
 0x104   :  { %845 = vmatpush.bf16.msra.mxu3 %v2412_v51  ;;  %v2957_v51 = vld [vmem:[#allocation2 + $0x314] sm:$0xf]  ;;  %v2297_v17 = vld [vmem:[#allocation2 + $0x308] sm:$0xf0]  ;;  %v2971_v18 = vld [vmem:[#allocation2 + $0x384] sm:$0xf]  ;;  %v2236_v20 = vor.u32 %v2939_v0, %v2233_v1  ;;  %v2544_v25 = vor.u32 %v2890_v10, %v2543_v9 }
 0x105   :  { %789 = vmatpush.bf16.msrb.mxu0 %v2212_v52  ;;  %v2380_v52 = vor.u32 %v2975_v39, %v2377_v41  ;;  %v2361_v21 = vld [vmem:[#allocation2 + $0x388] sm:$0xf0]  ;;  %v2671_v26 = vld [vmem:[#allocation2 + $0x1f0] sm:$0xf]  ;;  %v2922_v27 = vld [vmem:[#allocation2 + $0x1f4] sm:$0xf0] }
 0x106   :  { %808 = vmatpush.bf16.msrb.mxu1 %v2276_v60  ;;  %v2369_v60 = vld [vmem:[#allocation2 + $0x398] sm:$0xf0]  ;;  %v2364_v29 = vor.u32 %v2971_v18, %v2361_v21  ;;  %v2471_v31 = vld [vmem:[#allocation2 + $0x60] sm:$0xf]  ;;  %v2872_v32 = vld [vmem:[#allocation2 + $0x64] sm:$0xf0] }
 0x107   :  { %827 = vmatpush.bf16.msrb.mxu2 %v2340_v4  ;;  %v2479_v4 = vld [vmem:[#allocation2 + $0x70] sm:$0xf]  ;;  %v2372_v11 = vor.u32 %v2973_v58, %v2369_v60  ;;  %v2535_v33 = vld [vmem:[#allocation2 + $0xe0] sm:$0xf]  ;;  %v2904_v37 = vld [vmem:[#allocation2 + $0x164] sm:$0xf0] }
 0x108   :  { %846 = vmatpush.bf16.msra.mxu3 %v2404_v6  ;;  %v2874_v6 = vld [vmem:[#allocation2 + $0x74] sm:$0xf0]  ;;  %v2663_v38 = vld [vmem:[#allocation2 + $0x1e0] sm:$0xf]  ;;  %v2920_v39 = vld [vmem:[#allocation2 + $0x1e4] sm:$0xf0] }
 0x109   :  { %790 = vmatpush.bf16.msrb.mxu0 %v2204_v8  ;;  %v2308_v8 = vor.u32 %v2957_v51, %v2305_v56  ;;  %v2463_v46 = vld [vmem:[#allocation2 + $0x50] sm:$0xf]  ;;  %v2870_v48 = vld [vmem:[#allocation2 + $0x54] sm:$0xf0]  ;;  %v2519_v0 = vld [vmem:[#allocation2 + $0xc0] sm:$0xf] }
 0x10a   :  { %809 = vmatpush.bf16.msrb.mxu1 %v2268_v13  ;;  %v2172_v13 = vor.u32 %v2923_v62, %v2169_v63  ;;  %v2527_v49 = vld [vmem:[#allocation2 + $0xd0] sm:$0xf]  ;;  %v2886_v51 = vld [vmem:[#allocation2 + $0xd4] sm:$0xf0]  ;;  %v2464_v60 = vor.u32 %v2870_v48, %v2463_v46  ;;  %v2868_v63 = vld [vmem:[#allocation2 + $0x44] sm:$0xf0] }
 0x10b   :  { %828 = vmatpush.bf16.msrb.mxu2 %v2332_v22  ;;  %v2480_v22 = vor.u32 %v2874_v6, %v2479_v4  ;;  %v2655_v56 = vld [vmem:[#allocation2 + $0x1d0] sm:$0xf]  ;;  %v2918_v58 = vld [vmem:[#allocation2 + $0x1d4] sm:$0xf0]  ;;  %v2884_v4 = vld [vmem:[#allocation2 + $0xc4] sm:$0xf0] }
 0x10c   :  { %847 = vmatpush.bf16.msra.mxu3 %v2396_v23  ;;  %724 = vmatmul.bf16.gmra.mxu0 %v3224_v3  ;;  %v2607_v23 = vld [vmem:[#allocation2 + $0x170] sm:$0xf]  ;;  %v2656_v1 = vor.u32 %v2918_v58, %v2655_v56  ;;  %v2583_v6 = vld [vmem:[#allocation2 + $0x140] sm:$0xf]  ;;  %v2882_v18 = vld [vmem:[#allocation2 + $0xb4] sm:$0xf0] }
 0x10d   :  { %791 = vmatpush.bf16.msrb.mxu0 %v2196_v24  ;;  %743 = vmatmul.bf16.gmra.mxu1 %v3230_v12  ;;  %v2906_v24 = vld [vmem:[#allocation2 + $0x174] sm:$0xf0]  ;;  %v2559_v48 = vld [vmem:[#allocation2 + $0x110] sm:$0xf]  ;;  %v2860_v56 = vld [vmem:[#allocation2 + $0x4] sm:$0xf0] }
 0x10e   :  { %810 = vmatpush.bf16.msrb.mxu1 %v2260_v28  ;;  %762 = vmatmul.bf16.gmra.mxu2 %v3234_v16  ;;  %v2300_v28 = vor.u32 %v2955_v15, %v2297_v17  ;;  %v2608_v30 = vor.u32 %v2906_v24, %v2607_v23  ;;  %v2511_v15 = vld [vmem:[#allocation2 + $0xb0] sm:$0xf]  ;;  %v2898_v21 = vld [vmem:[#allocation2 + $0x134] sm:$0xf0]  ;;  %vm1810_vm1 = vcmask 523264  }
 0x10f   :  { %781 = vmatmul.bf16.gmra.mxu3 %v3236_v19  ;;  %829 = vmatpush.bf16.msrb.mxu2 %v2324_v34  ;;  %v2672_v34 = vor.u32 %v2922_v27, %v2671_v26  ;;  %v2914_v23 = vld [vmem:[#allocation2 + $0x1b4] sm:$0xf0]  ;;  %v2439_v27 = vld [vmem:[#allocation2 + $0x20] sm:$0xf] }
 0x110   :  { %848 = vmatpush.bf16.msra.mxu3 %v2388_v35  ;;  %v2888_v35 = vld [vmem:[#allocation2 + $0xe4] sm:$0xf0]  ;;  %v2878_v46 = vld [vmem:[#allocation2 + $0x94] sm:$0xf0] }
 0x111   :  { %792 = vmatpush.bf16.msrb.mxu0 %v2188_v36  ;;  %v2599_v36 = vld [vmem:[#allocation2 + $0x160] sm:$0xf]  ;;  %v2536_v41 = vor.u32 %v2888_v35, %v2535_v33  ;;  %v2896_v33 = vld [vmem:[#allocation2 + $0x124] sm:$0xf0] }
 0x112   :  { %811 = vmatpush.bf16.msrb.mxu1 %v2252_v40  ;;  %v2472_v40 = vor.u32 %v2872_v32, %v2471_v31  ;;  %v2600_v44 = vor.u32 %v2904_v37, %v2599_v36  ;;  %v2880_v31 = vld [vmem:[#allocation2 + $0xa4] sm:$0xf0]  ;;  %v2567_v32 = vld [vmem:[#allocation2 + $0x120] sm:$0xf] }
 0x113   :  { %830 = vmatpush.bf16.msrb.mxu2 %v2316_v50  ;;  %v2664_v50 = vor.u32 %v2920_v39, %v2663_v38  ;;  %v2912_v35 = vld [vmem:[#allocation2 + $0x1a4] sm:$0xf0]  ;;  %v2568_v38 = vor.u32 %v2896_v33, %v2567_v32  ;;  %v2431_v39 = vld [vmem:[#allocation2 + $0x10] sm:$0xf]  ;;  %v2465_v32 = vld [vmem:[#allocation2 + $0x58] sm:$0xf0] }
 0x114   :  { %849 = vmatpush.bf16.msra.mxu3 %v2380_v52  ;;  %v2591_v52 = vld [vmem:[#allocation2 + $0x150] sm:$0xf]  ;;  %v2885_v33 = vld [vmem:[#allocation2 + $0xd4] sm:$0xf] }
 0x115   :  { %793 = vmatpush.bf16.msrb.mxu0 %v2180_v53  ;;  %v2902_v53 = vld [vmem:[#allocation2 + $0x154] sm:$0xf0] }
 0x116   :  { %812 = vmatpush.bf16.msrb.mxu1 %v2244_v61  ;;  %v2528_v61 = vor.u32 %v2886_v51, %v2527_v49  ;;  %v2592_v62 = vor.u32 %v2902_v53, %v2591_v52  ;;  %v2894_v49 = vld [vmem:[#allocation2 + $0x114] sm:$0xf0]  ;;  %v2423_v53 = vld [vmem:[#allocation2] sm:$0xf] }
 0x117   :  { %831 = vmatpush.bf16.msrb.mxu2 %v2308_v8  ;;  %v2647_v8 = vld [vmem:[#allocation2 + $0x1c0] sm:$0xf]  ;;  %v2910_v51 = vld [vmem:[#allocation2 + $0x194] sm:$0xf0]  ;;  %v2560_v58 = vor.u32 %v2894_v49, %v2559_v48  ;;  %v2457_v48 = vld [vmem:[#allocation2 + $0x48] sm:$0xf0] }
 0x118   :  { %850 = vmatpush.bf16.msra.mxu3 %v2372_v11  ;;  %v2447_v11 = vld [vmem:[#allocation2 + $0x30] sm:$0xf]  ;;  %v2883_v49 = vld [vmem:[#allocation2 + $0xc4] sm:$0xf] }
 0x119   :  { %794 = vmatpush.bf16.msrb.mxu0 %v2172_v13  ;;  %v2866_v13 = vld [vmem:[#allocation2 + $0x34] sm:$0xf0] }
 0x11a   :  { %813 = vmatpush.bf16.msrb.mxu1 %v2236_v20  ;;  %v2575_v20 = vld [vmem:[#allocation2 + $0x130] sm:$0xf]  ;;  %v2448_v24 = vor.u32 %v2866_v13, %v2447_v11 }
 0x11b   :  { %832 = vmatpush.bf16.msrb.mxu2 %v2300_v28  ;;  %v2576_v26 = vor.u32 %v2898_v21, %v2575_v20  ;;  %v2864_v28 = vld [vmem:[#allocation2 + $0x24] sm:$0xf0]  ;;  %v2871_v20 = vld [vmem:[#allocation2 + $0x64] sm:$0xf]  ;;  %v2473_v21 = vld [vmem:[#allocation2 + $0x68] sm:$0xf0] }
 0x11c   :  { %851 = vmatpush.bf16.msra.mxu3 %v2364_v29  ;;  %795 = vmatmul.bf16.vlgmr.msrb.gmra.mxu0 %v3216_v55  ;;  %v2455_v55 = vld [vmem:[#allocation2 + $0x40] sm:$0xf]  ;;  %v2440_v36 = vor.u32 %v2864_v28, %v2439_v27  ;;  %v2665_v27 = vld [vmem:[#allocation2 + $0x1e8] sm:$0xf0]  ;;  %v2476_v28 = vor.u32 %v2871_v20, %v2473_v21 }
 0x11d   :  { %1183 = vmatpush.bf16.msra.mxu0 %v2480_v22  ;;  %814 = vmatmul.bf16.vlgmr.msrb.gmra.mxu1 %v3222_v2  ;;  %v2900_v2 = vld [vmem:[#allocation2 + $0x144] sm:$0xf0]  ;;  %v2456_v9 = vor.u32 %v2868_v63, %v2455_v55  ;;  %v2639_v22 = vld [vmem:[#allocation2 + $0x1b0] sm:$0xf]  ;;  %v2503_v29 = vld [vmem:[#allocation2 + $0xa0] sm:$0xf] }
 0x11e   :  { %1202 = vmatpush.bf16.msra.mxu1 %v2544_v25  ;;  %833 = vmatmul.bf16.vlgmr.msrb.gmra.mxu2 %v3228_v7  ;;  %v2916_v7 = vld [vmem:[#allocation2 + $0x1c4] sm:$0xf0]  ;;  %v2584_v10 = vor.u32 %v2900_v2, %v2583_v6  ;;  %v2512_v25 = vor.u32 %v2882_v18, %v2511_v15  ;;  %v2504_v37 = vor.u32 %v2880_v31, %v2503_v29  ;;  %v2615_v63 = vld [vmem:[#allocation2 + $0x180] sm:$0xf]  ;;  %v2545_v6 = vld [vmem:[#allocation2 + $0xf8] sm:$0xf0] }
 0x11f   :  { %1221 = vmatpush.bf16.msra.mxu2 %v2608_v30  ;;  %852 = vmatmul.bf16.vlgmr.msra.gmra.mxu3 %v3232_v14  ;;  %v2520_v14 = vor.u32 %v2884_v4, %v2519_v0  ;;  %v2648_v17 = vor.u32 %v2916_v7, %v2647_v8  ;;  %v2640_v30 = vor.u32 %v2914_v23, %v2639_v22  ;;  %v2873_v0 = vld [vmem:[#allocation2 + $0x74] sm:$0xf]  ;;  %v2609_v8 = vld [vmem:[#allocation2 + $0x178] sm:$0xf0]  ;;  %v2887_v22 = vld [vmem:[#allocation2 + $0xe4] sm:$0xf] }
 0x120   :  { %1240 = vmatpush.bf16.msrb.mxu3 %v2672_v34  ;;  %v2631_v34 = vld [vmem:[#allocation2 + $0x1a0] sm:$0xf]  ;;  %v2889_v4 = vld [vmem:[#allocation2 + $0xf4] sm:$0xf]  ;;  %v2537_v23 = vld [vmem:[#allocation2 + $0xe8] sm:$0xf0] }
 0x121   :  { %1184 = vmatpush.bf16.msra.mxu0 %v2472_v40  ;;  %v2862_v40 = vld [vmem:[#allocation2 + $0x14] sm:$0xf0]  ;;  %v2905_v2 = vld [vmem:[#allocation2 + $0x174] sm:$0xf]  ;;  %v2548_v15 = vor.u32 %v2889_v4, %v2545_v6  ;;  %v2540_v29 = vor.u32 %v2887_v22, %v2537_v23 }
 0x122   :  { %1203 = vmatpush.bf16.msra.mxu1 %v2536_v41  ;;  %v2495_v41 = vld [vmem:[#allocation2 + $0x90] sm:$0xf]  ;;  %v2432_v52 = vor.u32 %v2862_v40, %v2431_v39  ;;  %v2869_v31 = vld [vmem:[#allocation2 + $0x54] sm:$0xf]  ;;  %v2657_v39 = vld [vmem:[#allocation2 + $0x1d8] sm:$0xf0] }
 0x123   :  { %1222 = vmatpush.bf16.msra.mxu2 %v2600_v44  ;;  %v2632_v44 = vor.u32 %v2912_v35, %v2631_v34  ;;  %v2529_v35 = vld [vmem:[#allocation2 + $0xd8] sm:$0xf0]  ;;  %v2468_v40 = vor.u32 %v2869_v31, %v2465_v32  ;;  %v2913_v4 = vld [vmem:[#allocation2 + $0x1b4] sm:$0xf] }
 0x124   :  { %1241 = vmatpush.bf16.msrb.mxu3 %v2664_v50  ;;  %v2623_v50 = vld [vmem:[#allocation2 + $0x190] sm:$0xf]  ;;  %v2861_v23 = vld [vmem:[#allocation2 + $0x14] sm:$0xf]  ;;  %v2625_v31 = vld [vmem:[#allocation2 + $0x198] sm:$0xf0] }
 0x125   :  { %1185 = vmatpush.bf16.msra.mxu0 %v2464_v60  ;;  %v2487_v60 = vld [vmem:[#allocation2 + $0x80] sm:$0xf]  ;;  %v2624_v55 = vor.u32 %v2910_v51, %v2623_v50  ;;  %v2521_v51 = vld [vmem:[#allocation2 + $0xc8] sm:$0xf0] }
 0x126   :  { %1204 = vmatpush.bf16.msra.mxu1 %v2528_v61  ;;  %v2876_v61 = vld [vmem:[#allocation2 + $0x84] sm:$0xf0] }
 0x127   :  { %1223 = vmatpush.bf16.msra.mxu2 %v2592_v62  ;;  %v2551_v62 = vld [vmem:[#allocation2 + $0x100] sm:$0xf]  ;;  %v2488_v7 = vor.u32 %v2876_v61, %v2487_v60  ;;  %v2524_v60 = vor.u32 %v2883_v49, %v2521_v51 }
 0x128   :  { %1242 = vmatpush.bf16.msrb.mxu3 %v2656_v1  ;;  %v2481_v1 = vld [vmem:[#allocation2 + $0x78] sm:$0xf0] }
 0x129   :  { %1186 = vmatpush.bf16.msra.mxu0 %v2456_v9  ;;  %v2484_v13 = vor.u32 %v2873_v0, %v2481_v1  ;;  %v2897_v0 = vld [vmem:[#allocation2 + $0x134] sm:$0xf]  ;;  %v2577_v1 = vld [vmem:[#allocation2 + $0x138] sm:$0xf0] }
 0x12a   :  { %1205 = vmatpush.bf16.msra.mxu1 %v2520_v14  ;;  %v2921_v14 = vld [vmem:[#allocation2 + $0x1f4] sm:$0xf] }
 0x12b   :  { %1224 = vmatpush.bf16.msra.mxu2 %v2584_v10  ;;  %v2673_v10 = vld [vmem:[#allocation2 + $0x1f8] sm:$0xf0] }
 0x12c   :  { %1243 = vmatpush.bf16.msrb.mxu3 %v2648_v17  ;;  %800 = vmatmul.bf16.gmra.mxu0 %v3224_v3  ;;  %v2496_v3 = vor.u32 %v2878_v46, %v2495_v41  ;;  %v2612_v17 = vor.u32 %v2905_v2, %v2609_v8  ;;  %v2676_v18 = vor.u32 %v2921_v14, %v2673_v10  ;;  %v2867_v46 = vld [vmem:[#allocation2 + $0x44] sm:$0xf] }
 0x12d   :  { %1187 = vmatpush.bf16.msra.mxu0 %v2448_v24  ;;  %819 = vmatmul.bf16.gmra.mxu1 %v3230_v12  ;;  %v2892_v12 = vld [vmem:[#allocation2 + $0x104] sm:$0xf0]  ;;  %v2903_v24 = vld [vmem:[#allocation2 + $0x164] sm:$0xf]  ;;  %v2532_v41 = vor.u32 %v2885_v33, %v2529_v35  ;;  %v2580_v8 = vor.u32 %v2897_v0, %v2577_v1 }
 0x12e   :  { %1206 = vmatpush.bf16.msra.mxu1 %v2512_v25  ;;  %838 = vmatmul.bf16.gmra.mxu2 %v3234_v16  ;;  %v2908_v16 = vld [vmem:[#allocation2 + $0x184] sm:$0xf0]  ;;  %v2552_v9 = vor.u32 %v2892_v12, %v2551_v62  ;;  %v2601_v25 = vld [vmem:[#allocation2 + $0x168] sm:$0xf0]  ;;  %v2865_v62 = vld [vmem:[#allocation2 + $0x34] sm:$0xf] }
 0x12f   :  { %1225 = vmatpush.bf16.msra.mxu2 %v2576_v26  ;;  %857 = vmatmul.bf16.gmra.mxu3 %v3236_v19  ;;  %v2424_v19 = vor.u32 %v2860_v56, %v2423_v53  ;;  %v2616_v11 = vor.u32 %v2908_v16, %v2615_v63  ;;  %v2919_v26 = vld [vmem:[#allocation2 + $0x1e4] sm:$0xf]  ;;  %v2585_v53 = vld [vmem:[#allocation2 + $0x148] sm:$0xf0]  ;;  %v2881_v12 = vld [vmem:[#allocation2 + $0xb4] sm:$0xf] }
 0x130   :  { %1244 = vmatpush.bf16.msrb.mxu3 %v2640_v30  ;;  %v2604_v30 = vor.u32 %v2903_v24, %v2601_v25  ;;  %v2668_v34 = vor.u32 %v2919_v26, %v2665_v27  ;;  %v2915_v56 = vld [vmem:[#allocation2 + $0x1c4] sm:$0xf]  ;;  %v2513_v16 = vld [vmem:[#allocation2 + $0xb8] sm:$0xf0]  ;;  %v2877_v25 = vld [vmem:[#allocation2 + $0x94] sm:$0xf] }
 0x131   :  { %1188 = vmatpush.bf16.msra.mxu0 %v2440_v36  ;;  %v2901_v36 = vld [vmem:[#allocation2 + $0x154] sm:$0xf]  ;;  %v2516_v2 = vor.u32 %v2881_v12, %v2513_v16  ;;  %v2879_v14 = vld [vmem:[#allocation2 + $0xa4] sm:$0xf]  ;;  %v2433_v24 = vld [vmem:[#allocation2 + $0x18] sm:$0xf0] }
 0x132   :  { %1207 = vmatpush.bf16.msra.mxu1 %v2504_v37  ;;  %v2593_v37 = vld [vmem:[#allocation2 + $0x158] sm:$0xf0]  ;;  %v2436_v32 = vor.u32 %v2861_v23, %v2433_v24  ;;  %v2859_v35 = vld [vmem:[#allocation2 + $0x4] sm:$0xf] }
 0x133   :  { %1226 = vmatpush.bf16.msra.mxu2 %v2568_v38  ;;  %v2917_v38 = vld [vmem:[#allocation2 + $0x1d4] sm:$0xf]  ;;  %v2497_v27 = vld [vmem:[#allocation2 + $0x98] sm:$0xf0] }
 0x134   :  { %1245 = vmatpush.bf16.msrb.mxu3 %v2632_v44  ;;  %v2596_v44 = vor.u32 %v2901_v36, %v2593_v37  ;;  %v2660_v50 = vor.u32 %v2917_v38, %v2657_v39  ;;  %v2500_v33 = vor.u32 %v2877_v25, %v2497_v27  ;;  %v2425_v36 = vld [vmem:[#allocation2 + $0x8] sm:$0xf0]  ;;  %v2875_v37 = vld [vmem:[#allocation2 + $0x84] sm:$0xf] }
 0x135   :  { %1189 = vmatpush.bf16.msra.mxu0 %v2432_v52  ;;  %v2899_v52 = vld [vmem:[#allocation2 + $0x144] sm:$0xf]  ;;  %v2489_v39 = vld [vmem:[#allocation2 + $0x88] sm:$0xf0] }
 0x136   :  { %1208 = vmatpush.bf16.msra.mxu1 %v2496_v3  ;;  %v2649_v3 = vld [vmem:[#allocation2 + $0x1c8] sm:$0xf0]  ;;  %v2588_v61 = vor.u32 %v2899_v52, %v2585_v53  ;;  %v2492_v49 = vor.u32 %v2875_v37, %v2489_v39 }
 0x137   :  { %1227 = vmatpush.bf16.msra.mxu2 %v2560_v58  ;;  %v2460_v58 = vor.u32 %v2867_v46, %v2457_v48  ;;  %v2652_v63 = vor.u32 %v2915_v56, %v2649_v3  ;;  %v2617_v46 = vld [vmem:[#allocation2 + $0x188] sm:$0xf0]  ;;  %v2428_v48 = vor.u32 %v2859_v35, %v2425_v36 }
 0x138   :  { %1246 = vmatpush.bf16.msrb.mxu3 %v2624_v55  ;;  %v2449_v55 = vld [vmem:[#allocation2 + $0x38] sm:$0xf0] }
 0x139   :  { %1190 = vmatpush.bf16.msra.mxu0 %v2424_v19  ;;  %v2641_v19 = vld [vmem:[#allocation2 + $0x1b8] sm:$0xf0]  ;;  %v2452_v6 = vor.u32 %v2865_v62, %v2449_v55 }
 0x13a   :  { %1209 = vmatpush.bf16.msra.mxu1 %v2488_v7  ;;  %v2863_v7 = vld [vmem:[#allocation2 + $0x24] sm:$0xf]  ;;  %v2644_v10 = vor.u32 %v2913_v4, %v2641_v19 }
 0x13b   :  { %1228 = vmatpush.bf16.msra.mxu2 %v2552_v9  ;;  %v2441_v9 = vld [vmem:[#allocation2 + $0x28] sm:$0xf0] }
 0x13c   :  { %1247 = vmatpush.bf16.msrb.mxu3 %v2616_v11  ;;  %1191 = vmatmul.bf16.vlgmr.msra.gmra.mxu0 %v3208_v43  ;;  %v2505_v11 = vld [vmem:[#allocation2 + $0xa8] sm:$0xf0]  ;;  %v2444_v20 = vor.u32 %v2863_v7, %v2441_v9 }
 0x13d   :  { %1259 = vmatpush.bf16.msrb.mxu0 %v2484_v13  ;;  %1210 = vmatmul.bf16.vlgmr.msra.gmra.mxu1 %v3206_v42  ;;  %v2895_v13 = vld [vmem:[#allocation2 + $0x124] sm:$0xf]  ;;  %v2508_v21 = vor.u32 %v2879_v14, %v2505_v11 }
 0x13e   :  { %1278 = vmatpush.bf16.msrb.mxu1 %v2548_v15  ;;  %1229 = vmatmul.bf16.vlgmr.msra.gmra.mxu2 %v3212_v47  ;;  %v2569_v15 = vld [vmem:[#allocation2 + $0x128] sm:$0xf0] }
 0x13f   :  { %1297 = vmatpush.bf16.msrb.mxu2 %v2612_v17  ;;  %1248 = vmatmul.bf16.vlgmr.msrb.gmra.mxu3 %v3218_v57  ;;  %v2911_v17 = vld [vmem:[#allocation2 + $0x1a4] sm:$0xf]  ;;  %v2572_v22 = vor.u32 %v2895_v13, %v2569_v15 }
 0x140   :  { %1316 = vmatpush.bf16.msra.mxu3 %v2676_v18  ;;  %v2633_v18 = vld [vmem:[#allocation2 + $0x1a8] sm:$0xf0] }
 0x141   :  { %1260 = vmatpush.bf16.msrb.mxu0 %v2476_v28  ;;  %v2636_v26 = vor.u32 %v2911_v17, %v2633_v18  ;;  %v2893_v28 = vld [vmem:[#allocation2 + $0x114] sm:$0xf] }
 0x142   :  { %1279 = vmatpush.bf16.msrb.mxu1 %v2540_v29  ;;  %v2561_v29 = vld [vmem:[#allocation2 + $0x118] sm:$0xf0] }
 0x143   :  { %1298 = vmatpush.bf16.msrb.mxu2 %v2604_v30  ;;  %v2909_v30 = vld [vmem:[#allocation2 + $0x194] sm:$0xf] }
 0x144   :  { %1317 = vmatpush.bf16.msra.mxu3 %v2668_v34  ;;  %v2564_v34 = vor.u32 %v2893_v28, %v2561_v29  ;;  %v2628_v38 = vor.u32 %v2909_v30, %v2625_v31 }
 0x145   :  { %1261 = vmatpush.bf16.msrb.mxu0 %v2468_v40  ;;  %v2891_v40 = vld [vmem:[#allocation2 + $0x104] sm:$0xf] }
 0x146   :  { %1280 = vmatpush.bf16.msrb.mxu1 %v2532_v41  ;;  %v2553_v41 = vld [vmem:[#allocation2 + $0x108] sm:$0xf0] }
 0x147   :  { %1299 = vmatpush.bf16.msrb.mxu2 %v2596_v44  ;;  %v2907_v44 = vld [vmem:[#allocation2 + $0x184] sm:$0xf] }
 0x148   :  { %1318 = vmatpush.bf16.msra.mxu3 %v2660_v50  ;;  %v2556_v50 = vor.u32 %v2891_v40, %v2553_v41  ;;  %v2620_v51 = vor.u32 %v2907_v44, %v2617_v46 }
 0x149   :  { %1262 = vmatpush.bf16.msrb.mxu0 %v2460_v58 }
 0x14a   :  { %1281 = vmatpush.bf16.msrb.mxu1 %v2524_v60 }
 0x14b   :  { %1300 = vmatpush.bf16.msrb.mxu2 %v2588_v61 }
 0x14c   :  { %1319 = vmatpush.bf16.msra.mxu3 %v2652_v63  ;;  %1196 = vmatmul.bf16.gmra.mxu0 %v3210_v45 }
 0x14d   :  { %1263 = vmatpush.bf16.msrb.mxu0 %v2452_v6  ;;  %1215 = vmatmul.bf16.gmra.mxu1 %v3214_v54 }
 0x14e   :  { %1282 = vmatpush.bf16.msrb.mxu1 %v2516_v2  ;;  %1234 = vmatmul.bf16.gmra.mxu2 %v3220_v59 }
 0x14f   :  { %1301 = vmatpush.bf16.msrb.mxu2 %v2580_v8  ;;  %1253 = vmatmul.bf16.gmra.mxu3 %v3226_v5 }
 0x150   :  { %1320 = vmatpush.bf16.msra.mxu3 %v2644_v10 }
 0x151   :  { %1264 = vmatpush.bf16.msrb.mxu0 %v2444_v20 }
 0x152   :  { %1283 = vmatpush.bf16.msrb.mxu1 %v2508_v21 }
 0x153   :  { %1302 = vmatpush.bf16.msrb.mxu2 %v2572_v22 }
 0x154   :  { %1321 = vmatpush.bf16.msra.mxu3 %v2636_v26 }
 0x155   :  { %1265 = vmatpush.bf16.msrb.mxu0 %v2436_v32 }
 0x156   :  { %1284 = vmatpush.bf16.msrb.mxu1 %v2500_v33 }
 0x157   :  { %1303 = vmatpush.bf16.msrb.mxu2 %v2564_v34 }
 0x158   :  { %1322 = vmatpush.bf16.msra.mxu3 %v2628_v38 }
 0x159   :  { %1266 = vmatpush.bf16.msrb.mxu0 %v2428_v48 }
 0x15a   :  { %1285 = vmatpush.bf16.msrb.mxu1 %v2492_v49 }
 0x15b   :  { %1304 = vmatpush.bf16.msrb.mxu2 %v2556_v50 }
 0x15c   :  { %1323 = vmatpush.bf16.msra.mxu3 %v2620_v51  ;;  %1267 = vmatmul.bf16.vlgmr.msrb.gmra.mxu0 %v3208_v43 }
 0x15d   :  { %1286 = vmatmul.bf16.vlgmr.msrb.gmra.mxu1 %v3206_v42 }
 0x15e   :  { %1305 = vmatmul.bf16.vlgmr.msrb.gmra.mxu2 %v3212_v47 }
 0x15f   :  { %1324 = vmatmul.bf16.vlgmr.msra.gmra.mxu3 %v3218_v57 }
 0x16c   :  { %1272 = vmatmul.bf16.gmra.mxu0 %v3210_v45 }
 0x16d   :  { %1291 = vmatmul.bf16.gmra.mxu1 %v3214_v54 }
 0x16e   :  { %1310 = vmatmul.bf16.gmra.mxu2 %v3220_v59 }
 0x16f   :  { %1329 = vmatmul.bf16.gmra.mxu3 %v3226_v5 }
 0x179   :  { %v720_v52 = vpop.f32.mrf.mxu0 }
 0x17a   :  { %v739_v53 = vpop.f32.mrf.mxu1 }
 0x17b   :  { %v740_v35 = vadd.f32 %v739_v53, %v720_v52 }
 0x181   :  { %v758_v56 = vpop.f32.mrf.mxu2  ;;  %v722_v58 = vpop.f32.mrf.mxu0 }
 0x182   :  { %v777_v3 = vpop.f32.mrf.mxu3  ;;  %v741_v43 = vpop.f32.mrf.mxu1  ;;  %v759_v40 = vadd.f32 %v758_v56, %v740_v35  ;;  %v1335_v56 = vld [vmem:[%s3587_s4] sm:$0x3]  ;;  %v1362_v35 = vld [vmem:[%s3586_s1 + $0x8] sm:$0xff] }
 0x183   :  { %v742_v32 = vadd.f32 %v741_v43, %v722_v58 }
 0x184   :  { %v778_v50 = vadd.f32 %v777_v3, %v759_v40 }
 0x189   :  { %v760_v60 = vpop.f32.mrf.mxu2  ;;  %v725_v61 = vpop.f32.mrf.mxu0 }
 0x18a   :  { %v779_v42 = vpop.f32.mrf.mxu3  ;;  %v744_v47 = vpop.f32.mrf.mxu1  ;;  %v761_v36 = vadd.f32 %v760_v60, %v742_v32 }
 0x18b   :  { %v745_v31 = vadd.f32 %v744_v47, %v725_v61 }
 0x18c   :  { %v780_v46 = vadd.f32 %v779_v42, %v761_v36 }
 0x191   :  { %v763_v62 = vpop.f32.mrf.mxu2  ;;  %v727_v55 = vpop.f32.mrf.mxu0 }
 0x192   :  { %v782_v57 = vpop.f32.mrf.mxu3  ;;  %v746_v45 = vpop.f32.mrf.mxu1  ;;  %v764_v33 = vadd.f32 %v763_v62, %v745_v31 }
 0x193   :  { %v747_v44 = vadd.f32 %v746_v45, %v727_v55  ;;  %v1337_v45 = vperm.slane %v1335_v56, 0 }
 0x194   :  { %v783_v41 = vadd.f32 %v782_v57, %v764_v33 }
 0x199   :  { %v765_v12 = vpop.f32.mrf.mxu2  ;;  %v796_v63 = vpop.f32.mrf.mxu0 }
 0x19a   :  { %v784_v54 = vpop.f32.mrf.mxu3  ;;  %v815_v59 = vpop.f32.mrf.mxu1  ;;  %v766_v48 = vadd.f32 %v765_v12, %v747_v44 }
 0x19b   :  { %v816_v16 = vadd.f32 %v815_v59, %v796_v63 }
 0x19c   :  { %v785_v59 = vadd.f32 %v784_v54, %v766_v48 }
 0x1a1   :  { %v834_v5 = vpop.f32.mrf.mxu2  ;;  %v798_v4 = vpop.f32.mrf.mxu0 }
 0x1a2   :  { %v835_v0 = vadd.f32 %v834_v5, %v816_v16  ;;  %v853_v1 = vpop.f32.mrf.mxu3  ;;  %v817_v19 = vpop.f32.mrf.mxu1 }
 0x1a3   :  { %v818_v2 = vadd.f32 %v817_v19, %v798_v4 }
 0x1a4   :  { %v3270_v6 = vadd.f32 %v853_v1, %v835_v0 }
 0x1a9   :  { %v836_v8 = vpop.f32.mrf.mxu2  ;;  %v801_v14 = vpop.f32.mrf.mxu0 }
 0x1aa   :  { %v837_v7 = vadd.f32 %v836_v8, %v818_v2  ;;  %v855_v9 = vpop.f32.mrf.mxu3  ;;  %v820_v10 = vpop.f32.mrf.mxu1 }
 0x1ab   :  { %v821_v13 = vadd.f32 %v820_v10, %v801_v14 }
 0x1ac   :  { %v3272_v11 = vadd.f32 %v855_v9, %v837_v7 }
 0x1b1   :  { %v839_v15 = vpop.f32.mrf.mxu2  ;;  %v3274_v20 = vpop.f32.mrf.mxu0 }
 0x1b2   :  { %v840_v17 = vadd.f32 %v839_v15, %v821_v13  ;;  %v858_v18 = vpop.f32.mrf.mxu3  ;;  %v3276_v21 = vpop.f32.mrf.mxu1 }
 0x1b4   :  { %v3278_v22 = vadd.f32 %v858_v18, %v840_v17 }
 0x1b9   :  { %v3280_v23 = vpop.f32.mrf.mxu2  ;;  %v1192_v25 = vpop.f32.mrf.mxu0 }
 0x1ba   :  { %v3282_v24 = vpop.f32.mrf.mxu3  ;;  %v1211_v26 = vpop.f32.mrf.mxu1  ;;  %v1193_v16 = vadd.f32 %v1192_v25, %v778_v50 }
 0x1bc   :  { %v1212_v62 = vadd.f32 %v1211_v26, %v1193_v16 }
 0x1c1   :  { %v1230_v27 = vpop.f32.mrf.mxu2  ;;  %v1194_v29 = vpop.f32.mrf.mxu0 }
 0x1c2   :  { %v1249_v28 = vpop.f32.mrf.mxu3  ;;  %v1213_v30 = vpop.f32.mrf.mxu1  ;;  %v1195_v51 = vadd.f32 %v1194_v29, %v780_v46  ;;  %v1231_v42 = vadd.f32 %v1230_v27, %v1212_v62 }
 0x1c4   :  { %v1214_v52 = vadd.f32 %v1213_v30, %v1195_v51  ;;  %v1250_v19 = vadd.f32 %v1249_v28, %v1231_v42  ;;  %v2681_v28 = vld [vmem:[%s3586_s1 + $0x20] sm:$0xff] }
 0x1c6   :  { %v1341_v10 = vadd.f32 %v1337_v45, %v1250_v19 }
 0x1c8   :  { %v1349_v31 = vmax.f32 %v1341_v10, 0.0 }
 0x1c9   :  { %v1232_v34 = vpop.f32.mrf.mxu2  ;;  %v1197_v38 = vpop.f32.mrf.mxu0 }
 0x1ca   :  { %v1251_v37 = vpop.f32.mrf.mxu3  ;;  %v1216_v39 = vpop.f32.mrf.mxu1  ;;  %v1198_v49 = vadd.f32 %v1197_v38, %v783_v41  ;;  %v1233_v5 = vadd.f32 %v1232_v34, %v1214_v52  ;;  %v1361_v34 = vld [vmem:[%s3586_s1] sm:$0xff] }
 0x1cb   :  { %v3303_v38 = vpack.c.bf16 %v1362_v35, %v1361_v34  ;;  %v2989_v34 = vld [vmem:[%s3588_s5 + $0x10] sm:$0xff]  ;;  %v2998_v35 = vld [vmem:[%s3588_s5 + $0x58] sm:$0xff] }
 0x1cc   :  { %v1217_v61 = vadd.f32 %v1216_v39, %v1198_v49  ;;  %v1252_v12 = vadd.f32 %v1251_v37, %v1233_v5  ;;  %v1338_v39 = vperm.slane %v1335_v56, 1  ;;  %v823_v49 = vadd.f32 %v3276_v21, %v3274_v20  ;;  %v2683_v20 = vld [vmem:[%s3586_s1 + $0x30] sm:$0xff] }
 0x1ce   :  { %v1343_v7 = vadd.f32 %v1337_v45, %v1252_v12 }
 0x1d0   :  { %v1351_v18 = vmax.f32 %v1343_v7, 0.0  ;;  %v3009_v7 = vld [vmem:[%s3588_s5 + $0xb0] sm:$0xff] }
 0x1d1   :  { %v1235_v63 = vpop.f32.mrf.mxu2  ;;  %v1199_v43 = vpop.f32.mrf.mxu0 }
 0x1d2   :  { %v1254_v58 = vpop.f32.mrf.mxu3  ;;  %v1218_v47 = vpop.f32.mrf.mxu1  ;;  %v1236_v53 = vadd.f32 %v1235_v63, %v1217_v61  ;;  %v1200_v60 = vadd.f32 %v1199_v43, %v785_v59  ;;  %v1357_v36 = vpack.c.bf16 %v1351_v18, %v1349_v31  ;;  %v842_v59 = vadd.f32 %v3280_v23, %v823_v49  ;;  %v2684_v23 = vld [vmem:[%s3586_s1 + $0x38] sm:$0xff]  ;;  %v3000_v31 = vld [vmem:[%s3588_s5 + $0x68] sm:$0xff]  ;;  %v3013_v49 = vld [vmem:[%s3588_s5 + $0xd0] sm:$0xff] }
 0x1d3   :  { %v3002_v18 = vld [vmem:[%s3588_s5 + $0x78] sm:$0xff] }
 0x1d4   :  { %v1255_v57 = vadd.f32 %v1254_v58, %v1236_v53  ;;  %v1219_v3 = vadd.f32 %v1218_v47, %v1200_v60  ;;  %v861_v52 = vadd.f32 %v3282_v24, %v842_v59  ;;  %v1364_v24 = vld [vmem:[%s3586_s1 + $0x18] sm:$0xff] }
 0x1d6   :  { %v1345_v2 = vadd.f32 %v1337_v45, %v1255_v57  ;;  %v1421_v57 = vpack.c.bf16 %v2684_v23, %v2683_v20 }
 0x1d8   :  { %v1353_v13 = vmax.f32 %v1345_v2, 0.0 }
 0x1d9   :  { %v1237_v55 = vpop.f32.mrf.mxu2  ;;  %v1268_v1 = vpop.f32.mrf.mxu0 }
 0x1da   :  { %v1238_v54 = vadd.f32 %v1237_v55, %v1219_v3  ;;  %v1256_v0 = vpop.f32.mrf.mxu3  ;;  %v1287_v4 = vpop.f32.mrf.mxu1  ;;  %v1269_v14 = vadd.f32 %v1268_v1, %v3270_v6  ;;  %v2682_v6 = vld [vmem:[%s3586_s1 + $0x28] sm:$0xff]  ;;  %v2994_v1 = vld [vmem:[%s3588_s5 + $0x38] sm:$0xff] }
 0x1db   :  { %v3301_v37 = vpack.c.bf16 %v2682_v6, %v2681_v28  ;;  %v2990_v28 = vld [vmem:[%s3588_s5 + $0x18] sm:$0xff]  ;;  %v3016_v6 = vld [vmem:[%s3588_s5 + $0xe8] sm:$0xff] }
 0x1dc   :  { %v1257_v8 = vadd.f32 %v1256_v0, %v1238_v54  ;;  %v1288_v26 = vadd.f32 %v1287_v4, %v1269_v14  ;;  %v3010_v4 = vld [vmem:[%s3588_s5 + $0xb8] sm:$0xff] }
 0x1de   :  { %v1347_v9 = vadd.f32 %v1337_v45, %v1257_v8  ;;  %v2993_v8 = vld [vmem:[%s3588_s5 + $0x30] sm:$0xff] }
 0x1e0   :  { %v1355_v15 = vmax.f32 %v1347_v9, 0.0 }
 0x1e1   :  { %v1306_v17 = vpop.f32.mrf.mxu2  ;;  %v1270_v29 = vpop.f32.mrf.mxu0 }
 0x1e2   :  { %v1359_v25 = vpack.c.bf16 %v1355_v15, %v1353_v13  ;;  %v1325_v27 = vpop.f32.mrf.mxu3  ;;  %v1289_v30 = vpop.f32.mrf.mxu1  ;;  %v1307_v32 = vadd.f32 %v1306_v17, %v1288_v26  ;;  %v1271_v33 = vadd.f32 %v1270_v29, %v3272_v11  ;;  %v2992_v13 = vld [vmem:[%s3588_s5 + $0x28] sm:$0xff]  ;;  %v2991_v26 = vld [vmem:[%s3588_s5 + $0x20] sm:$0xff]  ;;  %v3001_v29 = vld [vmem:[%s3588_s5 + $0x70] sm:$0xff] }
 0x1e3   :  { %v3008_v15 = vld [vmem:[%s3588_s5 + $0xa8] sm:$0xff] }
 0x1e4   :  { %1379 = vmatpush.bf16.msra.mxu0 %v1359_v25  ;;  %1434 = vmatpush.bf16.msra.mxu2 %v1359_v25  ;;  %v1326_v11 = vadd.f32 %v1325_v27, %v1307_v32  ;;  %v1290_v40 = vadd.f32 %v1289_v30, %v1271_v33  ;;  %v3018_v25 = vld [vmem:[%s3588_s5 + $0xf8] sm:$0xff]  ;;  %v3007_v27 = vld [vmem:[%s3588_s5 + $0xa0] sm:$0xff]  ;;  %v3017_v30 = vld [vmem:[%s3588_s5 + $0xf0] sm:$0xff] }
 0x1e5   :  { %v2999_v32 = vld [vmem:[%s3588_s5 + $0x60] sm:$0xff]  ;;  %v3006_v33 = vld [vmem:[%s3588_s5 + $0x98] sm:$0xff] }
 0x1e6   :  { %v1342_v50 = vadd.f32 %v1338_v39, %v1326_v11  ;;  %v3004_v11 = vld [vmem:[%s3588_s5 + $0x88] sm:$0xff] }
 0x1e8   :  { %1380 = vmatpush.bf16.msra.mxu0 %v1357_v36  ;;  %1435 = vmatpush.bf16.msra.mxu2 %v1357_v36  ;;  %v1350_v58 = vmax.f32 %v1342_v50, 0.0  ;;  %v3005_v36 = vld [vmem:[%s3588_s5 + $0x90] sm:$0xff] }
 0x1e9   :  { %v1308_v41 = vpop.f32.mrf.mxu2  ;;  %v1273_v48 = vpop.f32.mrf.mxu0 }
 0x1ea   :  { %v1309_v44 = vadd.f32 %v1308_v41, %v1290_v40  ;;  %v1327_v46 = vpop.f32.mrf.mxu3  ;;  %v1292_v63 = vpop.f32.mrf.mxu1  ;;  %v1274_v61 = vadd.f32 %v1273_v48, %v3278_v22  ;;  %v1363_v22 = vld [vmem:[%s3586_s1 + $0x10] sm:$0xff]  ;;  %v3003_v40 = vld [vmem:[%s3588_s5 + $0x80] sm:$0xff]  ;;  %v2996_v48 = vld [vmem:[%s3588_s5 + $0x48] sm:$0xff] }
 0x1eb   :  { %2685 = vmatmul.msk.bf16.vlgmr.msra.gmra.mxu2 %vm71_vm0, %v3301_v37  ;;  %2677 = vmatmul.msk.bf16.vlgmr.msra.gmra.mxu0 %vm71_vm0, %v3303_v38  ;;  %v1366_v3 = vpack.c.bf16 %v1364_v24, %v1363_v22  ;;  %v2997_v41 = vld [vmem:[%s3588_s5 + $0x50] sm:$0xff] }
 0x1ec   :  { %v1328_v51 = vadd.f32 %v1327_v46, %v1309_v44  ;;  %v1293_v53 = vadd.f32 %v1292_v63, %v1274_v61  ;;  %1764 = vmatpush.bf16.msrb.mxu2 %v2994_v1  ;;  %1630 = vmatpush.bf16.msrb.mxu0 %v3010_v4  ;;  %v3014_v46 = vld [vmem:[%s3588_s5 + $0xd8] sm:$0xff]  ;;  %v3011_v61 = vld [vmem:[%s3588_s5 + $0xc0] sm:$0xff] }
 0x1ee   :  { %v1344_v16 = vadd.f32 %v1338_v39, %v1328_v51  ;;  %v2995_v51 = vld [vmem:[%s3588_s5 + $0x40] sm:$0xff] }
 0x1f0   :  { %v1352_v43 = vmax.f32 %v1344_v16, 0.0  ;;  %1765 = vmatpush.bf16.msrb.mxu2 %v2993_v8  ;;  %1631 = vmatpush.bf16.msrb.mxu0 %v3009_v7  ;;  %v3012_v16 = vld [vmem:[%s3588_s5 + $0xc8] sm:$0xff]  ;;  %v3032_v8 = vld [vmem:[%s3589_s6] ss:$0 sm:$0xff] }
 0x1f1   :  { %v1311_v47 = vpop.f32.mrf.mxu2  ;;  %v1275_v62 = vpop.f32.mrf.mxu0 }
 0x1f2   :  { %v1330_v60 = vpop.f32.mrf.mxu3  ;;  %v1358_v5 = vpack.c.bf16 %v1352_v43, %v1350_v58  ;;  %v1312_v21 = vadd.f32 %v1311_v47, %v1293_v53  ;;  %v1276_v56 = vadd.f32 %v1275_v62, %v861_v52  ;;  %v1294_v42 = vpop.f32.mrf.mxu1 }
 0x1f4   :  { %v1331_v55 = vadd.f32 %v1330_v60, %v1312_v21  ;;  %v1295_v45 = vadd.f32 %v1294_v42, %v1276_v56  ;;  %1766 = vmatpush.bf16.msrb.mxu2 %v2992_v13  ;;  %1632 = vmatpush.bf16.msrb.mxu0 %v3008_v15 }
 0x1f6   :  { %v1346_v19 = vadd.f32 %v1338_v39, %v1331_v55 }
 0x1f8   :  { %v1354_v14 = vmax.f32 %v1346_v19, 0.0  ;;  %1767 = vmatpush.bf16.msrb.mxu2 %v2991_v26  ;;  %1633 = vmatpush.bf16.msrb.mxu0 %v3007_v27 }
 0x1f9   :  { %v1313_v12 = vpop.f32.mrf.mxu2 }
 0x1fa   :  { %v1314_v54 = vadd.f32 %v1313_v12, %v1295_v45  ;;  %v1332_v0 = vpop.f32.mrf.mxu3 }
 0x1fb   :  { %2686 = vmatmul.msk.bf16.gmra.mxu2 %vm71_vm0, %v1421_v57  ;;  %2678 = vmatmul.msk.bf16.gmra.mxu0 %vm71_vm0, %v1366_v3 }
 0x1fc   :  { %v1333_v2 = vadd.f32 %v1332_v0, %v1314_v54  ;;  %1768 = vmatpush.bf16.msrb.mxu2 %v2990_v28  ;;  %1634 = vmatpush.bf16.msrb.mxu0 %v3006_v33 }
 0x1fe   :  { %v1348_v9 = vadd.f32 %v1338_v39, %v1333_v2  ;;  %v2987_v39 = vld [vmem:[%s3588_s5] sm:$0xff] }
 0x200   :  { %v1356_v10 = vmax.f32 %v1348_v9, 0.0  ;;  %1769 = vmatpush.bf16.msrb.mxu2 %v2989_v34  ;;  %1635 = vmatpush.bf16.msrb.mxu0 %v3005_v36 }
 0x202   :  { %v1360_v17 = vpack.c.bf16 %v1356_v10, %v1354_v14 }
 0x204   :  { %1398 = vmatpush.bf16.msra.mxu1 %v1360_v17  ;;  %1453 = vmatpush.bf16.msrb.mxu3 %v1360_v17 }
 0x205   :  { %1636 = vmatpush.bf16.msrb.mxu0 %v3004_v11 }
 0x208   :  { %1399 = vmatpush.bf16.msra.mxu1 %v1358_v5  ;;  %1454 = vmatpush.bf16.msrb.mxu3 %v1358_v5 }
 0x209   :  { %1637 = vmatpush.bf16.msrb.mxu0 %v3003_v40 }
 0x20b   :  { %2679 = vmatmul.msk.bf16.vlgmr.msra.gmra.mxu1 %vm71_vm0, %v3303_v38  ;;  %2687 = vmatmul.msk.bf16.vlgmr.msrb.gmra.mxu3 %vm71_vm0, %v3301_v37  ;;  %v3015_v37 = vld [vmem:[%s3588_s5 + $0xe0] sm:$0xff]  ;;  %v2988_v38 = vld [vmem:[%s3588_s5 + $0x8] sm:$0xff] }
 0x20c   :  { %1783 = vmatpush.bf16.msra.mxu3 %v3002_v18  ;;  %1649 = vmatpush.bf16.msrb.mxu1 %v3018_v25 }
 0x20d   :  { %1770 = vmatpush.bf16.msrb.mxu2 %v2988_v38 }
 0x210   :  { %1784 = vmatpush.bf16.msra.mxu3 %v3001_v29  ;;  %1650 = vmatpush.bf16.msrb.mxu1 %v3017_v30 }
 0x211   :  { %1771 = vmatpush.bf16.msrb.mxu2 %v2987_v39 }
 0x214   :  { %1785 = vmatpush.bf16.msra.mxu3 %v3000_v31  ;;  %1651 = vmatpush.bf16.msrb.mxu1 %v3016_v6 }
 0x218   :  { %1786 = vmatpush.bf16.msra.mxu3 %v2999_v32  ;;  %1652 = vmatpush.bf16.msrb.mxu1 %v3015_v37 }
 0x21b   :  { %2680 = vmatmul.msk.bf16.gmra.mxu1 %vm71_vm0, %v1366_v3  ;;  %2688 = vmatmul.msk.bf16.gmra.mxu3 %vm71_vm0, %v1421_v57 }
 0x21c   :  { %1787 = vmatpush.bf16.msra.mxu3 %v2998_v35  ;;  %1653 = vmatpush.bf16.msrb.mxu1 %v3014_v46 }
 0x220   :  { %1788 = vmatpush.bf16.msra.mxu3 %v2997_v41  ;;  %1654 = vmatpush.bf16.msrb.mxu1 %v3013_v49 }
 0x224   :  { %1789 = vmatpush.bf16.msra.mxu3 %v2996_v48  ;;  %1655 = vmatpush.bf16.msrb.mxu1 %v3012_v16 }
 0x228   :  { %1790 = vmatpush.bf16.msra.mxu3 %v2995_v51  ;;  %1656 = vmatpush.bf16.msrb.mxu1 %v3011_v61  ;;  %v2833_v61 = vld [vmem:[%s3590_s7 + $0x1] ss:$2 sm:$0x3] }
 0x268   :  { %v1382_v44 = vpop.f32.mrf.mxu0 }
 0x26e   :  { %v1437_v50 = vpop.f32.mrf.mxu2 }
 0x270   :  { %v1384_v63 = vpop.f32.mrf.mxu0 }
 0x271   :  { %v1411_v59 = vpack.c.bf16 %v1384_v63, %v1382_v44 }
 0x273   :  { %1772 = vmatmul.bf16.vlgmr.msrb.gmra.mxu2 %v1411_v59  ;;  %v1868_v59 = vlaneseq }
 0x275   :  { %v1869_v16 = vshrl.u32 %v1868_v59, 7 }
 0x276   :  { %v1439_v58 = vpop.f32.mrf.mxu2 }
 0x277   :  { %v1466_v43 = vpack.c.bf16 %v1439_v58, %v1437_v50  ;;  %v3449_v58 = vadd.s32 24, %v1869_v16 }
 0x278   :  { %v1387_v47 = vpop.f32.mrf.mxu0 }
 0x279   :  { %1638 = vmatmul.bf16.vlgmr.msrb.gmra.mxu0 %v1466_v43  ;;  %v3451_v43 = vperm.slane %v2833_v61, 0 }
 0x27b   :  { %vm1910_vm2 = vcmp.eq.s32.totalorder %v3449_v58, %v3451_v43  ;;  %vm1904_vm8 = vcmp.eq.s32.totalorder %v1869_v16, %v3451_v43 }
 0x27e   :  { %v1442_v52 = vpop.f32.mrf.mxu2 }
 0x280   :  { %v1389_v53 = vpop.f32.mrf.mxu0 }
 0x281   :  { %v1413_v60 = vpack.c.bf16 %v1389_v53, %v1387_v47  ;;  %v3453_v47 = vperm.slane %v2833_v61, 1  ;;  %v1870_v53 = vadd.s32 8, %v1869_v16 }
 0x283   :  { %1777 = vmatmul.bf16.gmra.mxu2 %v1413_v60  ;;  %vm1911_vm3 = vcmp.eq.s32.totalorder %v3449_v58, %v3453_v47  ;;  %v3068_v60 = vmov 1.0   ;;  %vm1906_vm6 = vcmp.eq.s32.totalorder %v1870_v53, %v3451_v43  ;;  %vm1907_vm7 = vcmp.eq.s32.totalorder %v1870_v53, %v3453_v47 }
 0x284   :  { %2850 = vmatpush.msk.msra.mxu2 %vm1911_vm3, %v3068_v60  ;;  %3021 = vmatpush.msk.msra.mxu1 %vm1910_vm2, %v3068_v60  ;;  %vm1905_vm9 = vcmp.eq.s32.totalorder %v1869_v16, %v3453_v47 }
 0x285   :  { %3025 = vmatpush.msk.msrb.mxu3 %vm1911_vm3, %v3068_v60 }
 0x286   :  { %v1444_v62 = vpop.f32.mrf.mxu2 }
 0x287   :  { %v1468_v5 = vpack.c.bf16 %v1444_v62, %v1442_v52  ;;  %v3455_v52 = vadd.s32 16, %v1869_v16  ;;  %v1873_v62 = vld [vmem:[%s3590_s7] ss:$2 sm:$0x3] }
 0x288   :  { %v1401_v20 = vpop.f32.mrf.mxu1 }
 0x289   :  { %1643 = vmatmul.bf16.gmra.mxu0 %v1468_v5  ;;  %vm1908_vm4 = vcmp.eq.s32.totalorder %v3455_v52, %v3451_v43  ;;  %vm1909_vm5 = vcmp.eq.s32.totalorder %v3455_v52, %v3453_v47  ;;  %v1874_v5 = vperm.slane %v1873_v62, 0 }
 0x28a   :  { %2851 = vmatpush.msk.msra.mxu2 %vm1909_vm5, %v3068_v60  ;;  %3022 = vmatpush.msk.msra.mxu1 %vm1908_vm4, %v3068_v60 }
 0x28b   :  { %3026 = vmatpush.msk.msrb.mxu3 %vm1909_vm5, %v3068_v60  ;;  %vm1876_vm10 = vcmp.eq.s32.totalorder %v1869_v16, %v1874_v5  ;;  %vm1878_vm12 = vcmp.eq.s32.totalorder %v1870_v53, %v1874_v5  ;;  %vm1880_vm14 = vcmp.eq.s32.totalorder %v3455_v52, %v1874_v5 }
 0x28c   :  { %2852 = vmatpush.msk.msra.mxu2 %vm1907_vm7, %v3068_v60  ;;  %3023 = vmatpush.msk.msra.mxu1 %vm1906_vm6, %v3068_v60 }
 0x28d   :  { %3027 = vmatpush.msk.msrb.mxu3 %vm1907_vm7, %v3068_v60 }
 0x28e   :  { %v1456_v21 = vpop.f32.mrf.mxu3  ;;  %2853 = vmatpush.msk.msra.mxu2 %vm1905_vm9, %v3068_v60  ;;  %3024 = vmatpush.msk.msra.mxu1 %vm1904_vm8, %v3068_v60 }
 0x28f   :  { %3028 = vmatpush.msk.msrb.mxu3 %vm1905_vm9, %v3068_v60 }
 0x290   :  { %v1403_v56 = vpop.f32.mrf.mxu1 }
 0x291   :  { %v1412_v23 = vpack.c.bf16 %v1403_v56, %v1401_v20  ;;  %v1875_v20 = vperm.slane %v1873_v62, 1  ;;  %v3069_v56 = vmov 0.0  }
 0x293   :  { %1791 = vmatmul.bf16.vlgmr.msra.gmra.mxu3 %v1412_v23  ;;  %vm1877_vm11 = vcmp.eq.s32.totalorder %v1869_v16, %v1875_v20  ;;  %vm1879_vm13 = vcmp.eq.s32.totalorder %v1870_v53, %v1875_v20  ;;  %v2834_v23 = vsel %vm1904_vm8, 1.0, %v3069_v56  ;;  %vm1881_vm15 = vcmp.eq.s32.totalorder %v3455_v52, %v1875_v20 }
 0x296   :  { %v1458_v22 = vpop.f32.mrf.mxu3 }
 0x297   :  { %v1467_v24 = vpack.c.bf16 %v1458_v22, %v1456_v21  ;;  %v2835_v22 = vsel %vm1905_vm9, 1.0, %v3069_v56 }
 0x298   :  { %v1406_v42 = vpop.f32.mrf.mxu1 }
 0x299   :  { %1657 = vmatmul.bf16.vlgmr.msrb.gmra.mxu1 %v1467_v24  ;;  %v3504_v24 = vsel %vm1876_vm10, 1.0, %v3069_v56 }
 0x29e   :  { %v1461_v57 = vpop.f32.mrf.mxu3 }
 0x2a0   :  { %v1408_v3 = vpop.f32.mrf.mxu1 }
 0x2a1   :  { %v1414_v55 = vpack.c.bf16 %v1408_v3, %v1406_v42  ;;  %v3506_v42 = vsel %vm1877_vm11, 1.0, %v3069_v56  ;;  %v2837_v3 = vsel %vm1907_vm7, 1.0, %v3069_v56 }
 0x2a3   :  { %1796 = vmatmul.bf16.gmra.mxu3 %v1414_v55  ;;  %v3512_v55 = vsel %vm1878_vm12, 1.0, %v3069_v56 }
 0x2a6   :  { %v1463_v45 = vpop.f32.mrf.mxu3 }
 0x2a7   :  { %v1469_v12 = vpack.c.bf16 %v1463_v45, %v1461_v57  ;;  %v2836_v57 = vsel %vm1906_vm6, 1.0, %v3069_v56  ;;  %v3514_v45 = vsel %vm1879_vm13, 1.0, %v3069_v56 }
 0x2a9   :  { %1662 = vmatmul.bf16.gmra.mxu1 %v1469_v12 }
 0x2f6   :  { %v1639_v54 = vpop.f32.mrf.mxu0  ;;  %v1773_v0 = vpop.f32.mrf.mxu2 }
 0x2fe   :  { %v1641_v7 = vpop.f32.mrf.mxu0  ;;  %v1775_v14 = vpop.f32.mrf.mxu2 }
 0x306   :  { %v1644_v29 = vpop.f32.mrf.mxu0  ;;  %v1778_v28 = vpop.f32.mrf.mxu2 }
 0x30e   :  { %v1646_v38 = vpop.f32.mrf.mxu0  ;;  %v1780_v41 = vpop.f32.mrf.mxu2 }
 0x316   :  { %v1658_v1 = vpop.f32.mrf.mxu1  ;;  %v1792_v4 = vpop.f32.mrf.mxu3 }
 0x317   :  { %v1659_v19 = vadd.f32 %v1658_v1, %v1639_v54 }
 0x319   :  { %v1774_v2 = vadd.f32 %v1773_v0, %v1659_v19 }
 0x31b   :  { %v1793_v9 = vadd.f32 %v1792_v4, %v1774_v2 }
 0x31d   :  { %v1806_v10 = vadd.f32 %v3032_v8, %v1793_v9 }
 0x31e   :  { %v1660_v13 = vpop.f32.mrf.mxu1  ;;  %v1794_v15 = vpop.f32.mrf.mxu3 }
 0x31f   :  { %v1661_v17 = vadd.f32 %v1660_v13, %v1641_v7  ;;  %v1852_v18 = vmul.f32 %v1806_v10, %v1806_v10 }
 0x321   :  { %v1776_v25 = vadd.f32 %v1775_v14, %v1661_v17  ;;  %v1856_v26 = vsel %vm1810_vm1, %v1852_v18, 0.0  ;;  %v2839_v17 = vsel %vm1909_vm5, 1.0, %v3069_v56  ;;  %v3528_v18 = vsel %vm1880_vm14, 1.0, %v3069_v56 }
 0x322   :  { %1857 = vadd.xlane.f32.xlu0 %v1856_v26  ;;  %vm2127_vm14 = vcmask 1040384  }
 0x323   :  { %v1795_v27 = vadd.f32 %v1794_v15, %v1776_v25  ;;  %v2838_v15 = vsel %vm1908_vm4, 1.0, %v3069_v56  ;;  %v3530_v25 = vsel %vm1881_vm15, 1.0, %v3069_v56  ;;  %vm2132_vm15 = vcmp.lt.s32.totalorder %v1868_v59, 256 }
 0x325   :  { %v1807_v30 = vadd.f32 %v3032_v8, %v1795_v27 }
 0x326   :  { %v1663_v31 = vpop.f32.mrf.mxu1  ;;  %v1797_v6 = vpop.f32.mrf.mxu3 }
 0x327   :  { %v1664_v32 = vadd.f32 %v1663_v31, %v1644_v29  ;;  %v1853_v33 = vmul.f32 %v1807_v30, %v1807_v30 }
 0x329   :  { %v1779_v34 = vadd.f32 %v1778_v28, %v1664_v32  ;;  %v1859_v35 = vsel %vm1810_vm1, %v1853_v33, 0.0 }
 0x32a   :  { %1860 = vadd.xlane.f32.xlu0 %v1859_v35  ;;  %v2841_v35 = vsel %vm1911_vm3, 1.0, %v3069_v56 }
 0x32b   :  { %v1798_v36 = vadd.f32 %v1797_v6, %v1779_v34  ;;  %v2840_v34 = vsel %vm1910_vm2, 1.0, %v3069_v56 }
 0x32d   :  { %v1808_v37 = vadd.f32 %v3032_v8, %v1798_v36 }
 0x32e   :  { %v1665_v11 = vpop.f32.mrf.mxu1  ;;  %v1799_v48 = vpop.f32.mrf.mxu3 }
 0x32f   :  { %v1666_v39 = vadd.f32 %v1665_v11, %v1646_v38  ;;  %v1854_v40 = vmul.f32 %v1808_v37, %v1808_v37 }
 0x331   :  { %v1781_v44 = vadd.f32 %v1780_v41, %v1666_v39  ;;  %v1862_v46 = vsel %vm1810_vm1, %v1854_v40, 0.0 }
 0x332   :  { %1863 = vadd.xlane.f32.xlu1 %v1862_v46 }
 0x333   :  { %v1800_v49 = vadd.f32 %v1799_v48, %v1781_v44 }
 0x335   :  { %v1809_v50 = vadd.f32 %v3032_v8, %v1800_v49 }
 0x337   :  { %2817 = vmatpush.xpose.msk.msra.mxu0 %vm1810_vm1, %v1809_v50  ;;  %v1855_v51 = vmul.f32 %v1809_v50, %v1809_v50 }
 0x339   :  { %v1865_v63 = vsel %vm1810_vm1, %v1855_v51, 0.0 }
 0x33a   :  { %1866 = vadd.xlane.f32.xlu1 %v1865_v63 }
 0x33b   :  { %2818 = vmatpush.xpose.msk.msra.mxu0 %vm1810_vm1, %v1808_v37 }
 0x33f   :  { %2819 = vmatpush.xpose.msk.msra.mxu0 %vm1810_vm1, %v1807_v30 }
 0x343   :  { %2820 = vmatpush.xpose.msk.msra.mxu0 %vm1810_vm1, %v1806_v10 }
 0x346   :  { %2821 = vmatmul.msk.f32.vlgmr.msra.gmra.mxu0 %vm1810_vm1, %v1806_v10 }
 0x347   :  { %2842 = vmatpush.msk.msrb.mxu0 %vm1910_vm2, %v3068_v60 }
 0x349   :  { %2843 = vmatpush.msk.msrb.mxu0 %vm1908_vm4, %v3068_v60 }
 0x34b   :  { %2844 = vmatpush.msk.msrb.mxu0 %vm1906_vm6, %v3068_v60  ;;  %vm1883_vm6 = vcmp.eq.s32.totalorder %v3449_v58, %v1875_v20 }
 0x34d   :  { %2845 = vmatpush.msk.msrb.mxu0 %vm1904_vm8, %v3068_v60 }
 0x34e   :  { %2822 = vmatmul.msk.f32.gmra.mxu0 %vm1810_vm1, %v1807_v30 }
 0x356   :  { %2823 = vmatmul.msk.f32.gmra.mxu0 %vm1810_vm1, %v1808_v37  ;;  %v3544_v37 = vsel %vm1883_vm6, 1.0, %v3069_v56 }
 0x35e   :  { %2824 = vmatmul.msk.f32.gmra.mxu0 %vm1810_vm1, %v1809_v50  ;;  %vm1882_vm1 = vcmp.eq.s32.totalorder %v3449_v58, %v1874_v5 }
 0x35f   :  { %v3542_v36 = vsel %vm1882_vm1, 1.0, %v3069_v56 }
 0x395   :  { %v1858_v21 = vpop.xlane.xlu0 %1857 }
 0x396   :  { %v2050_v54 = vmul.f32 %v2834_v23, %v1858_v21  ;;  %v2051_v0 = vmul.f32 %v2835_v22, %v1858_v21  ;;  %v2024_v1 = vmul.f32 %v3504_v24, %v1858_v21  ;;  %v2025_v4 = vmul.f32 %v3506_v42, %v1858_v21 }
 0x39d   :  { %v1861_v12 = vpop.xlane.xlu0 %1860 }
 0x39e   :  { %v2052_v19 = vmul.f32 %v2836_v57, %v1861_v12  ;;  %v2053_v2 = vmul.f32 %v2837_v3, %v1861_v12  ;;  %v2026_v8 = vmul.f32 %v3512_v55, %v1861_v12  ;;  %v2027_v7 = vmul.f32 %v3514_v45, %v1861_v12 }
 0x3a0   :  { %v2058_v9 = vadd.f32 %v2052_v19, %v2050_v54  ;;  %v2067_v14 = vadd.f32 %v2053_v2, %v2051_v0  ;;  %v2032_v10 = vadd.f32 %v2026_v8, %v2024_v1  ;;  %v2041_v13 = vadd.f32 %v2027_v7, %v2025_v4 }
 0x3a5   :  { %v1864_v26 = vpop.xlane.xlu1 %1863 }
 0x3a6   :  { %v2054_v27 = vmul.f32 %v2838_v15, %v1864_v26  ;;  %v2055_v29 = vmul.f32 %v2839_v17, %v1864_v26  ;;  %v2028_v30 = vmul.f32 %v3528_v18, %v1864_v26  ;;  %v2029_v28 = vmul.f32 %v3530_v25, %v1864_v26 }
 0x3a8   :  { %v2059_v31 = vadd.f32 %v2058_v9, %v2054_v27  ;;  %v2068_v32 = vadd.f32 %v2067_v14, %v2055_v29  ;;  %v2033_v33 = vadd.f32 %v2032_v10, %v2028_v30  ;;  %v2042_v6 = vadd.f32 %v2041_v13, %v2029_v28 }
 0x3ad   :  { %v1867_v38 = vpop.xlane.xlu1 %1866 }
 0x3ae   :  { %v2056_v11 = vmul.f32 %v2840_v34, %v1867_v38  ;;  %v2057_v39 = vmul.f32 %v2841_v35, %v1867_v38  ;;  %v2030_v40 = vmul.f32 %v3542_v36, %v1867_v38  ;;  %v2031_v41 = vmul.f32 %v3544_v37, %v1867_v38 }
 0x3b0   :  { %v2060_v44 = vadd.f32 %v2059_v31, %v2056_v11  ;;  %v2069_v46 = vadd.f32 %v2068_v32, %v2057_v39  ;;  %v2034_v48 = vadd.f32 %v2033_v33, %v2030_v40  ;;  %v2043_v49 = vadd.f32 %v2042_v6, %v2031_v41 }
 0x3b2   :  { %v2035_v61 = vrot.slane %v2034_v48, 4  ;;  %v2061_v58 = vrot.slane %v2060_v44, 4  ;;  %v2044_v52 = vrot.slane %v2043_v49, 4  ;;  %v2070_v53 = vrot.slane %v2069_v46, 4 }
 0x3b4   :  { %v2036_v43 = vadd.f32 %v2035_v61, %v2034_v48  ;;  %v2062_v47 = vadd.f32 %v2061_v58, %v2060_v44  ;;  %v2045_v5 = vadd.f32 %v2044_v52, %v2043_v49  ;;  %v2071_v20 = vadd.f32 %v2070_v53, %v2069_v46 }
 0x3b6   :  { %v2037_v60 = vrot.slane %v2036_v43, 2  ;;  %v2063_v62 = vrot.slane %v2062_v47, 2  ;;  %v2046_v23 = vrot.slane %v2045_v5, 2  ;;  %v2072_v22 = vrot.slane %v2071_v20, 2 }
 0x3b8   :  { %v2038_v21 = vadd.f32 %v2037_v60, %v2036_v43  ;;  %v2064_v56 = vadd.f32 %v2063_v62, %v2062_v47  ;;  %v2047_v12 = vadd.f32 %v2046_v23, %v2045_v5  ;;  %v2073_v54 = vadd.f32 %v2072_v22, %v2071_v20 }
 0x3ba   :  { %v2039_v57 = vrot.slane %v2038_v21, 1  ;;  %v2065_v3 = vrot.slane %v2064_v56, 1  ;;  %v2048_v4 = vrot.slane %v2047_v12, 1  ;;  %v2074_v8 = vrot.slane %v2073_v54, 1 }
 0x3bc   :  { %v2040_v0 = vadd.f32 %v2039_v57, %v2038_v21  ;;  %v2066_v1 = vadd.f32 %v2065_v3, %v2064_v56  ;;  %v2049_v15 = vadd.f32 %v2048_v4, %v2047_v12  ;;  %v2075_v17 = vadd.f32 %v2074_v8, %v2073_v54 }
 0x3be   :  { %v2076_v7 = vmax.f32 %v2040_v0, 1e-16  ;;  %v3556_v14 = vmax.f32 %v2066_v1, 1e-16  ;;  %v3561_v27 = vmax.f32 %v2049_v15, 1e-16 }
 0x3bf   :  { %v3563_v30 = vmax.f32 %v2075_v17, 1e-16 }
 0x3c0   :  { %3033 = vrsqrt.f32 %v2076_v7  ;;  %vm2084_vm2 = vweird.f32 %v2076_v7  ;;  %vm2108_vm5 = vweird.f32 %v3556_v14  ;;  %vm2094_vm9 = vweird.f32 %v3561_v27 }
 0x3c1   :  { %3035 = vrsqrt.f32 %v3556_v14  ;;  %vm2118_vm12 = vweird.f32 %v3563_v30 }
 0x3c2   :  { %3037 = vrsqrt.f32 %v3561_v27 }
 0x3c3   :  { %v1840_v50 = vpop.f32.mrf.mxu0  ;;  %3039 = vrsqrt.f32 %v3563_v30 }
 0x3c4   :  { %2846 = vmatmul.msk.f32.vlgmr.msrb.gmra.mxu0 %vm71_vm0, %v1840_v50  ;;  %2854 = vmatmul.msk.f32.vlgmr.msra.gmra.mxu2 %vm71_vm0, %v1840_v50 }
 0x3c6   :  { %v3034_v33 = vpop.eup %3033 }
 0x3c7   :  { %v3036_v6 = vpop.eup %3035  ;;  %v2079_v35 = vmul.f32 %v3034_v33, %v2076_v7 }
 0x3c8   :  { %v2103_v11 = vmul.f32 %v3036_v6, %v3556_v14  ;;  %v3038_v39 = vpop.eup %3037  ;;  %vm2109_vm3 = vweird.f32 %v3036_v6 }
 0x3c9   :  { %v3040_v41 = vpop.eup %3039  ;;  %v2089_v48 = vmul.f32 %v3038_v39, %v3561_v27  ;;  %vm2110_vm7 = vmor %vm2108_vm5, %vm2109_vm3  ;;  %vm2095_vm8 = vweird.f32 %v3038_v39 }
 0x3ca   :  { %vm2119_vm10 = vweird.f32 %v3040_v41  ;;  %vm2096_vm11 = vmor %vm2094_vm9, %vm2095_vm8 }
 0x3cb   :  { %v1843_v51 = vpop.f32.mrf.mxu0  ;;  %v2090_v58 = vmul.f32 %v3038_v39, %v2089_v48  ;;  %vm2120_vm13 = vmor %vm2118_vm12, %vm2119_vm10 }
 0x3cc   :  { %2847 = vmatmul.msk.f32.vlgmr.msra.gmra.mxu1 %vm71_vm0, %v1843_v51  ;;  %2855 = vmatmul.msk.f32.gmra.mxu2 %vm71_vm0, %v1843_v51  ;;  %v2113_v51 = vmul.f32 %v3040_v41, %v3563_v30 }
 0x3ce   :  { %v2114_v52 = vmul.f32 %v3040_v41, %v2113_v51 }
 0x3d0   :  { %v2115_v56 = vmul.f32 0.5, %v2114_v52 }
 0x3d2   :  { %v2116_v0 = vsub.f32 1.5, %v2115_v56 }
 0x3d3   :  { %v1846_v63 = vpop.f32.mrf.mxu0 }
 0x3d4   :  { %2848 = vmatmul.msk.f32.gmra.mxu1 %vm71_vm0, %v1846_v63  ;;  %2856 = vmatmul.msk.f32.gmra.mxu2 %vm71_vm0, %v1846_v63  ;;  %v2117_v7 = vmul.f32 %v3040_v41, %v2116_v0 }
 0x3d6   :  { %v2121_v14 = vsel %vm2120_vm13, %v3040_v41, %v2117_v7 }
 0x3db   :  { %v1849_v16 = vpop.f32.mrf.mxu0 }
 0x3dc   :  { %2849 = vmatmul.msk.f32.gmra.mxu1 %vm71_vm0, %v1849_v16  ;;  %2857 = vmatmul.msk.f32.vlgmr.msrb.gmra.mxu3 %vm71_vm0, %v1849_v16  ;;  %vm2085_vm0 = vweird.f32 %v3034_v33 }
 0x3dd   :  { %vm2086_vm4 = vmor %vm2084_vm2, %vm2085_vm0 }
 0x441   :  { %v1957_v19 = vpop.f32.mrf.mxu0 }
 0x442   :  { %v1998_v10 = vmul.f32 %v3504_v24, %v1957_v19 }
 0x447   :  { %v1986_v2 = vpop.f32.mrf.mxu2 }
 0x448   :  { %v1999_v28 = vmul.f32 %v3506_v42, %v1986_v2 }
 0x449   :  { %v1960_v9 = vpop.f32.mrf.mxu1 }
 0x44a   :  { %v2000_v13 = vmul.f32 %v3512_v55, %v1960_v9 }
 0x44c   :  { %v2006_v26 = vadd.f32 %v2000_v13, %v1998_v10 }
 0x44f   :  { %v1989_v29 = vpop.f32.mrf.mxu2 }
 0x450   :  { %v2001_v31 = vmul.f32 %v3514_v45, %v1989_v29  ;;  %v2080_v45 = vmul.f32 %v3034_v33, %v2079_v35 }
 0x451   :  { %v1963_v32 = vpop.f32.mrf.mxu1 }
 0x452   :  { %v2015_v24 = vadd.f32 %v2001_v31, %v1999_v28  ;;  %v2002_v55 = vmul.f32 %v3528_v18, %v1963_v32  ;;  %v2104_v18 = vmul.f32 %v3036_v6, %v2103_v11  ;;  %v2081_v50 = vmul.f32 0.5, %v2080_v45 }
 0x454   :  { %v2007_v34 = vadd.f32 %v2006_v26, %v2002_v55  ;;  %v2105_v16 = vmul.f32 0.5, %v2104_v18  ;;  %v2082_v47 = vsub.f32 1.5, %v2081_v50 }
 0x456   :  { %v2106_v62 = vsub.f32 1.5, %v2105_v16  ;;  %v2083_v21 = vmul.f32 %v3034_v33, %v2082_v47 }
 0x457   :  { %v1992_v38 = vpop.f32.mrf.mxu2 }
 0x458   :  { %v2003_v42 = vmul.f32 %v3530_v25, %v1992_v38  ;;  %v2107_v57 = vmul.f32 %v3036_v6, %v2106_v62  ;;  %v2087_v54 = vsel %vm2086_vm4, %v3034_v33, %v2083_v21 }
 0x459   :  { %v1966_v40 = vpop.f32.mrf.mxu1 }
 0x45a   :  { %v2016_v44 = vadd.f32 %v2015_v24, %v2003_v42  ;;  %v2004_v46 = vmul.f32 %v3542_v36, %v1966_v40  ;;  %v2091_v36 = vmul.f32 0.5, %v2090_v58  ;;  %v2111_v19 = vsel %vm2110_vm7, %v3036_v6, %v2107_v57 }
 0x45c   :  { %v2008_v49 = vadd.f32 %v2007_v34, %v2004_v46  ;;  %v2092_v3 = vsub.f32 1.5, %v2091_v36 }
 0x45e   :  { %v2009_v63 = vrot.slane %v2008_v49, 4  ;;  %v2093_v2 = vmul.f32 %v3038_v39, %v2092_v3 }
 0x45f   :  { %v1995_v61 = vpop.f32.mrf.mxu3 }
 0x460   :  { %v2010_v43 = vadd.f32 %v2009_v63, %v2008_v49  ;;  %v2005_v25 = vmul.f32 %v3544_v37, %v1995_v61  ;;  %v2097_v13 = vsel %vm2096_vm11, %v3038_v39, %v2093_v2 }
 0x462   :  { %v2011_v53 = vrot.slane %v2010_v43, 2  ;;  %v2017_v60 = vadd.f32 %v2016_v44, %v2005_v25 }
 0x464   :  { %v2012_v5 = vadd.f32 %v2011_v53, %v2010_v43  ;;  %v2018_v20 = vrot.slane %v2017_v60, 4 }
 0x466   :  { %v2013_v23 = vrot.slane %v2012_v5, 1  ;;  %v2019_v22 = vadd.f32 %v2018_v20, %v2017_v60 }
 0x468   :  { %v2014_v12 = vadd.f32 %v2013_v23, %v2012_v5  ;;  %v2020_v37 = vrot.slane %v2019_v22, 2 }
 0x46a   :  { %v2098_v1 = vmul.f32 %v2087_v54, %v2014_v12  ;;  %v2021_v4 = vadd.f32 %v2020_v37, %v2019_v22 }
 0x46c   :  { %v2122_v8 = vmul.f32 %v2111_v19, %v2098_v1  ;;  %v2022_v9 = vrot.slane %v2021_v4, 1 }
 0x46e   :  { %v2023_v10 = vadd.f32 %v2022_v9, %v2021_v4 }
 0x470   :  { %v2099_v15 = vmul.f32 %v2097_v13, %v2023_v10 }
 0x472   :  { %v2123_v17 = vmul.f32 %v2121_v14, %v2099_v15 }
 0x474   :  { %v2126_v26 = vrot.slane %v2123_v17, 7 }
 0x476   :  { %v2128_v29 = vsel %vm2127_vm14, %v2122_v8, %v2126_v26 }
 0x477   :  { %2134 = vst.msk [vmem:[%s3591_s8] sm:$0x3] %vm2132_vm15, %v2128_v29 }
 0x478   :  { %2139 = vsyncmov [#allocation3] }
 0x47b   :  { %s2140_s16 = vpop.sfrf %2139 }
 0x47c   :  { %p2858_p0 = scmp.ne.s32.totalorder %s2140_s16, 0 }
 0x47e   :  { %2144 = shalt.err (%p2858_p0)  }

</bundles_post_ra>
